<compile_context>
chip_gen: v7x
topology: tpu7x:2x2x1
jax: 0.10.0
libtpu: 0.0.40
codegen_flags: <defaults>
</compile_context>

<pallas_src>
import functools
import math

import jax
import jax.numpy as jnp
import numpy as np
from jax import lax
from jax.experimental import pallas as pl
from jax.experimental.pallas import tpu as pltpu

# ---------------- configuration (small synthetic shapes) ----------------
B = 2                                   # batch
C = 3                                   # image channels
IMG = 16                                # H = W
PATCH = 8
N_PATCH = (IMG // PATCH) ** 2           # 4 patches
PATCH_DIM = C * PATCH * PATCH           # 192
SEQ_VIT = N_PATCH + 1                   # +CLS = 5 real tokens
SEQ_PAD = 8                             # per-sample token block padded to 8 sublanes
D_VIT = 32                              # ViT hidden size
N_HEADS = 4
HEAD_DIM = D_VIT // N_HEADS
D_FF = 4 * D_VIT                        # 128
N_LAYERS = 2
LN_EPS = 1e-12

VOCAB = 6                               # Receiver default vocab_size
T_MSG = 8                               # message length
D_GPT = 32                              # GPT2 n_embd (small synthetic)
LINEAR_DIM = 123                        # Receiver default linear_dim
LINEAR_PAD = 128                        # lane-dense padded output width

MASK_VALUE = -0.7 * float(np.finfo(np.float32).max)   # dtype-aware large negative

# packed small-parameter array layout: one vector per row, 128 lanes
ROWS_PER_LAYER = 8     # ln1_g, ln1_b, b_qkv, b_o, ln2_g, ln2_b, b_ff1, b_ff2
GROW = N_LAYERS * ROWS_PER_LAYER        # global rows: lnf_g, lnf_b, b_img, b_fused
PVEC_ROWS = ((GROW + 4 + 7) // 8) * 8   # pad row count to a multiple of 8


# ---------------------------- kernel ----------------------------------
def _layer_norm(x, g, b):
    mu = jnp.mean(x, axis=-1, keepdims=True)
    var = jnp.mean((x - mu) ** 2, axis=-1, keepdims=True)
    return (x - mu) * lax.rsqrt(var + LN_EPS) * g + b


def receiver_kernel(scores_ref, tokens_ref, tokbias_ref, atxt_ref, aimg_ref,
                    mask_ref, bigmask_ref, patchw_ref,
                    wqkv_ref, wo_ref, wff1_ref, wff2_ref,
                    wimg_ref, wfused_ref, pvec_ref,
                    txt_out_ref, img_out_ref, *, batch):
    """Whole batch in one grid step: txt + img paths fused in one kernel body."""
    bs = batch * SEQ_PAD                                             # padded image tokens
    pv = pvec_ref[...]                                               # (PVEC_ROWS, 128) packed params

    # ---------------- text path: pool (one matmul) then fused affine ----------------
    pooled_txt = jnp.dot(atxt_ref[...], scores_ref[...],
                         preferred_element_type=jnp.float32)         # (B, VOCAB) mean over T
    b_fused = pv[GROW + 3:GROW + 4, :]
    txt_out_ref[...] = (jnp.dot(pooled_txt, wfused_ref[...],
                                preferred_element_type=jnp.float32)
                        + b_fused)                                   # (W_emb∘W_txt), padded to 128

    # ---------------- image path: batched ViT encoder --------------------------------
    # tokens already laid out (B*SEQ_PAD, PATCH_DIM) with zero rows for CLS/pad;
    # CLS + positions + patch bias come in as one precomputed additive constant.
    x = (jnp.dot(tokens_ref[...], patchw_ref[...],
                 preferred_element_type=jnp.float32) + tokbias_ref[...])   # (bs, D_VIT)

    mask = mask_ref[...]                                             # (H*bs, bs) block-diag + pad mask
    bigmask = bigmask_ref[...]                                       # (H*bs, D_VIT) head-column mask

    for l in range(N_LAYERS):
        base = l * ROWS_PER_LAYER
        ln1_g = pv[base + 0:base + 1, :D_VIT]
        ln1_b = pv[base + 1:base + 2, :D_VIT]
        b_qkv = pv[base + 2:base + 3, :3 * D_VIT]
        b_o = pv[base + 3:base + 4, :D_VIT]
        ln2_g = pv[base + 4:base + 5, :D_VIT]
        ln2_b = pv[base + 5:base + 6, :D_VIT]
        b_ff1 = pv[base + 6:base + 7, :D_FF]
        b_ff2 = pv[base + 7:base + 8, :D_VIT]

        # --- pre-LN multi-head self-attention (fused across heads & samples) ---
        h = _layer_norm(x, ln1_g, ln1_b)
        qkv = jnp.dot(h, wqkv_ref[l], preferred_element_type=jnp.float32) + b_qkv
        q = qkv[:, 0:D_VIT]                    # attention scale pre-folded into Wqkv/bqkv q-columns
        k = qkv[:, D_VIT:2 * D_VIT]
        v = qkv[:, 2 * D_VIT:3 * D_VIT]

        # block-diagonal Q (heads stacked along sublanes) -> ONE QK^T matmul
        q_rep = jnp.concatenate([q] * N_HEADS, axis=0)               # (H*bs, D_VIT), aligned blocks
        q_bd = q_rep * bigmask
        sc = lax.dot_general(q_bd, k, (((1,), (1,)), ((), ())),
                             preferred_element_type=jnp.float32)     # (H*bs, bs)
        sc = sc + mask
        sc = sc - jnp.max(sc, axis=-1, keepdims=True)
        p = jnp.exp(sc)
        p = p * pl.reciprocal(jnp.sum(p, axis=-1, keepdims=True), approx=True)

        # ONE P@V matmul over full V, then fold head blocks back (aligned static slices)
        pv_full = jnp.dot(p, v, preferred_element_type=jnp.float32)  # (H*bs, D_VIT)
        masked = pv_full * bigmask
        heads = masked[0:bs]
        for hh in range(1, N_HEADS):
            heads = heads + masked[hh * bs:(hh + 1) * bs]            # (bs, D_VIT)
        x = x + jnp.dot(heads, wo_ref[l],
                        preferred_element_type=jnp.float32) + b_o

        # --- pre-LN MLP ---
        h2 = _layer_norm(x, ln2_g, ln2_b)
        m = jnp.dot(h2, wff1_ref[l], preferred_element_type=jnp.float32) + b_ff1
        m = jax.nn.gelu(m, approximate=True)  # TODO(synk): HF ViT uses exact erf-GELU
        x = x + jnp.dot(m, wff2_ref[l], preferred_element_type=jnp.float32) + b_ff2

    lnf_g = pv[GROW + 0:GROW + 1, :D_VIT]
    lnf_b = pv[GROW + 1:GROW + 2, :D_VIT]
    b_img = pv[GROW + 2:GROW + 3, :]
    xf = _layer_norm(x, lnf_g, lnf_b)                                # ViT final layernorm
    pooled_img = jnp.dot(aimg_ref[...], xf,
                         preferred_element_type=jnp.float32)         # (B, D_VIT), mean over 5 real tokens
    img_out_ref[...] = (jnp.dot(pooled_img, wimg_ref[...],
                                preferred_element_type=jnp.float32)
                        + b_img)                                     # W_img (padded to 128)


# ---------------------------- wrapper ----------------------------------
def _full_spec(shape):
    n = len(shape)
    return pl.BlockSpec(shape, lambda i, _n=n: (0,) * _n)


def receiver_forward(scores, receiver_input, params):
    # TODO(synk): the ndim>4 branch (list of image sets per sample) is not implemented.
    assert receiver_input.ndim == 4
    b, c, hgt, wid = receiver_input.shape
    assert (c, hgt, wid) == (C, IMG, IMG)
    assert scores.shape == (b, T_MSG, VOCAB)
    bs = b * SEQ_PAD

    # --- NCHW -> padded per-sample token blocks (CLS row + pad rows are zero) ---
    patches = receiver_input.reshape(b, C, IMG // PATCH, PATCH, IMG // PATCH, PATCH)
    patches = patches.transpose(0, 2, 4, 1, 3, 5).reshape(b, N_PATCH, PATCH_DIM)
    tokens = jnp.zeros((b, SEQ_PAD, PATCH_DIM), jnp.float32)
    tokens = tokens.at[:, 1:1 + N_PATCH, :].set(patches)
    tokens = tokens.reshape(bs, PATCH_DIM)

    scores2d = scores.reshape(b * T_MSG, VOCAB)

    # --- constant additive token bias: CLS + positions + conv bias, pad rows zero ---
    bias_one = jnp.zeros((SEQ_PAD, D_VIT), jnp.float32)
    bias_one = bias_one.at[0].set(params["cls"][0] + params["pos"][0])
    bias_one = bias_one.at[1:SEQ_VIT].set(params["patch_b"] + params["pos"][1:SEQ_VIT])
    tok_bias = jnp.tile(bias_one, (b, 1))                            # (bs, D_VIT)

    # --- constant block-averaging pooling matrices (pad tokens weighted 0) ---
    a_txt = np.zeros((b, b * T_MSG), np.float32)
    a_img = np.zeros((b, bs), np.float32)
    for bb in range(b):
        a_txt[bb, bb * T_MSG:(bb + 1) * T_MSG] = 1.0 / T_MSG
        a_img[bb, bb * SEQ_PAD:bb * SEQ_PAD + SEQ_VIT] = 1.0 / SEQ_VIT
    a_txt = jnp.asarray(a_txt)
    a_img = jnp.asarray(a_img)

    # --- attention mask: block-diagonal per sample, pad columns masked, tiled over heads ---
    seg = np.repeat(np.arange(b), SEQ_PAD)
    real = np.tile(np.arange(SEQ_PAD) < SEQ_VIT, b)
    base_mask = np.where((seg[:, None] == seg[None, :]) & real[None, :],
                         0.0, MASK_VALUE).astype(np.float32)
    mask_sub = jnp.asarray(np.tile(base_mask, (N_HEADS, 1)))         # (H*bs, bs)

    # --- head-column mask for the block-diagonal Q build and the head fold ---
    hm = np.zeros((N_HEADS * bs, D_VIT), np.float32)
    for hh in range(N_HEADS):
        hm[hh * bs:(hh + 1) * bs, hh * HEAD_DIM:(hh + 1) * HEAD_DIM] = 1.0
    bigmask = jnp.asarray(hm)

    # --- fold attention scale into the q-columns of Wqkv / bqkv (exact) ---
    scale = 1.0 / math.sqrt(HEAD_DIM)
    w_qkv = params["w_qkv"].at[:, :, :D_VIT].multiply(scale)
    b_qkv = params["b_qkv"].at[:, :, :D_VIT].multiply(scale)

    # --- lane-dense heads: pad 123 -> 128, fuse the two text-path affines ---
    pad = LINEAR_PAD - LINEAR_DIM
    w_img_pad = jnp.pad(params["w_img"], ((0, 0), (0, pad)))
    b_img_pad = jnp.pad(params["b_img"], ((0, 0), (0, pad)))
    w_txt_pad = jnp.pad(params["w_txt"], ((0, 0), (0, pad)))
    b_txt_pad = jnp.pad(params["b_txt"], ((0, 0), (0, pad)))
    w_fused = jnp.dot(params["w_emb"], w_txt_pad)                    # (VOCAB, 128)
    b_fused = jnp.dot(params["b_emb"], w_txt_pad) + b_txt_pad        # (1, 128)

    # --- pack all small vectors into one (PVEC_ROWS, 128) array (one DMA) ---
    pvec = jnp.zeros((PVEC_ROWS, LINEAR_PAD), jnp.float32)
    rows = []
    for l in range(N_LAYERS):
        o = l * ROWS_PER_LAYER
        rows += [(o + 0, params["ln1_g"][l]), (o + 1, params["ln1_b"][l]),
                 (o + 2, b_qkv[l]), (o + 3, params["b_o"][l]),
                 (o + 4, params["ln2_g"][l]), (o + 5, params["ln2_b"][l]),
                 (o + 6, params["b_ff1"][l]), (o + 7, params["b_ff2"][l])]
    rows += [(GROW + 0, params["lnf_g"]), (GROW + 1, params["lnf_b"]),
             (GROW + 2, b_img_pad), (GROW + 3, b_fused)]
    for r, vec in rows:
        pvec = pvec.at[r:r + 1, :vec.shape[-1]].set(vec)

    inputs = [
        scores2d, tokens, tok_bias, a_txt, a_img, mask_sub, bigmask,
        params["patch_w"], w_qkv, params["w_o"], params["w_ff1"], params["w_ff2"],
        w_img_pad, w_fused, pvec,
    ]
    in_specs = [_full_spec(a.shape) for a in inputs]

    # TODO(synk): on v7x with real (larger) shapes, switch to grid=(B,) with
    # dimension_semantics=("parallel",) to use both TensorCores; at B=2 toy shapes
    # fixed launch overhead dominates so one grid step is faster.
    txt_pad_out, img_pad_out = pl.pallas_call(
        functools.partial(receiver_kernel, batch=b),
        grid=(1,),
        in_specs=in_specs,
        out_specs=(pl.BlockSpec((b, LINEAR_PAD), lambda i: (0, 0)),
                   pl.BlockSpec((b, LINEAR_PAD), lambda i: (0, 0))),
        out_shape=(jax.ShapeDtypeStruct((b, LINEAR_PAD), jnp.float32),
                   jax.ShapeDtypeStruct((b, LINEAR_PAD), jnp.float32)),
        compiler_params=pltpu.CompilerParams(dimension_semantics=("arbitrary",)),
    )(*inputs)

    return txt_pad_out[:, :LINEAR_DIM], img_pad_out[:, :LINEAR_DIM]


def init_params(key):
    ks = iter(jax.random.split(key, 32))
    std = 0.02

    def w(shape):
        return jax.random.normal(next(ks), shape, jnp.float32) * std

    return {
        # ViT patch embedding (Conv2d kernel=stride=PATCH, flattened)
        "patch_w": w((PATCH_DIM, D_VIT)),
        "patch_b": jnp.zeros((1, D_VIT), jnp.float32),
        "cls": w((1, D_VIT)),
        "pos": w((SEQ_VIT, D_VIT)),
        # transformer layers (stacked over N_LAYERS)
        "ln1_g": jnp.ones((N_LAYERS, 1, D_VIT), jnp.float32),
        "ln1_b": jnp.zeros((N_LAYERS, 1, D_VIT), jnp.float32),
        "w_qkv": w((N_LAYERS, D_VIT, 3 * D_VIT)),
        "b_qkv": jnp.zeros((N_LAYERS, 1, 3 * D_VIT), jnp.float32),
        "w_o": w((N_LAYERS, D_VIT, D_VIT)),
        "b_o": jnp.zeros((N_LAYERS, 1, D_VIT), jnp.float32),
        "ln2_g": jnp.ones((N_LAYERS, 1, D_VIT), jnp.float32),
        "ln2_b": jnp.zeros((N_LAYERS, 1, D_VIT), jnp.float32),
        "w_ff1": w((N_LAYERS, D_VIT, D_FF)),
        "b_ff1": jnp.zeros((N_LAYERS, 1, D_FF), jnp.float32),
        "w_ff2": w((N_LAYERS, D_FF, D_VIT)),
        "b_ff2": jnp.zeros((N_LAYERS, 1, D_VIT), jnp.float32),
        "lnf_g": jnp.ones((1, D_VIT), jnp.float32),
        "lnf_b": jnp.zeros((1, D_VIT), jnp.float32),
        # Receiver heads
        "w_img": w((D_VIT, LINEAR_DIM)),
        "b_img": jnp.zeros((1, LINEAR_DIM), jnp.float32),
        "w_emb": w((VOCAB, D_GPT)),          # text_embedding: Linear(vocab, gpt_hidden)
        "b_emb": jnp.zeros((1, D_GPT), jnp.float32),
        "w_txt": w((D_GPT, LINEAR_DIM)),
        "b_txt": jnp.zeros((1, LINEAR_DIM), jnp.float32),
    }


if __name__ == "__main__":
    key = jax.random.PRNGKey(0)
    k_param, k_img, k_scores = jax.random.split(key, 3)

    params = init_params(k_param)
    receiver_input = jax.random.normal(k_img, (B, C, IMG, IMG), jnp.float32)   # NCHW
    scores = jax.random.normal(k_scores, (B, T_MSG, VOCAB), jnp.float32)

    fwd = jax.jit(functools.partial(receiver_forward, params=params))
    txt_out, img_out = fwd(scores, receiver_input)
    jax.block_until_ready((txt_out, img_out))

    assert txt_out.shape == (B, LINEAR_DIM), txt_out.shape
    assert img_out.shape == (B, LINEAR_DIM), img_out.shape
    assert bool(jnp.all(jnp.isfinite(txt_out))) and bool(jnp.all(jnp.isfinite(img_out)))
    print("KERNEL_OK")
</pallas_src>

<mosaic_0001>
module attributes {stable_mosaic.version = 11 : i64} {
  func.func @receiver_kernel(%arg0: i32, %arg1: memref<16x6xf32, #tpu.memory_space<vmem>>, %arg2: memref<16x192xf32, #tpu.memory_space<vmem>>, %arg3: memref<16x32xf32, #tpu.memory_space<vmem>>, %arg4: memref<2x16xf32, #tpu.memory_space<vmem>>, %arg5: memref<2x16xf32, #tpu.memory_space<vmem>>, %arg6: memref<64x16xf32, #tpu.memory_space<vmem>>, %arg7: memref<64x32xf32, #tpu.memory_space<vmem>>, %arg8: memref<192x32xf32, #tpu.memory_space<vmem>>, %arg9: memref<2x32x96xf32, #tpu.memory_space<vmem>>, %arg10: memref<2x32x32xf32, #tpu.memory_space<vmem>>, %arg11: memref<2x32x128xf32, #tpu.memory_space<vmem>>, %arg12: memref<2x128x32xf32, #tpu.memory_space<vmem>>, %arg13: memref<32x128xf32, #tpu.memory_space<vmem>>, %arg14: memref<6x128xf32, #tpu.memory_space<vmem>>, %arg15: memref<24x128xf32, #tpu.memory_space<vmem>>, %arg16: memref<2x128xf32, #tpu.memory_space<vmem>>, %arg17: memref<2x128xf32, #tpu.memory_space<vmem>>) attributes {dimension_semantics = [#tpu.dimension_semantics<arbitrary>], iteration_bounds = array<i64: 1>, scalar_prefetch = 0 : i64, scratch_operands = 0 : i64, tpu.core_type = #tpu.core_type<tc>, window_params = [{pipeline_mode = #tpu.pipeline_mode<synchronous>, transform_indices = @transform_0, window_bounds = array<i64: 16, 6>}, {pipeline_mode = #tpu.pipeline_mode<synchronous>, transform_indices = @transform_1, window_bounds = array<i64: 16, 192>}, {pipeline_mode = #tpu.pipeline_mode<synchronous>, transform_indices = @transform_2, window_bounds = array<i64: 16, 32>}, {pipeline_mode = #tpu.pipeline_mode<synchronous>, transform_indices = @transform_3, window_bounds = array<i64: 2, 16>}, {pipeline_mode = #tpu.pipeline_mode<synchronous>, transform_indices = @transform_4, window_bounds = array<i64: 2, 16>}, {pipeline_mode = #tpu.pipeline_mode<synchronous>, transform_indices = @transform_5, window_bounds = array<i64: 64, 16>}, {pipeline_mode = #tpu.pipeline_mode<synchronous>, transform_indices = @transform_6, window_bounds = array<i64: 64, 32>}, {pipeline_mode = #tpu.pipeline_mode<synchronous>, transform_indices = @transform_7, window_bounds = array<i64: 192, 32>}, {pipeline_mode = #tpu.pipeline_mode<synchronous>, transform_indices = @transform_8, window_bounds = array<i64: 2, 32, 96>}, {pipeline_mode = #tpu.pipeline_mode<synchronous>, transform_indices = @transform_9, window_bounds = array<i64: 2, 32, 32>}, {pipeline_mode = #tpu.pipeline_mode<synchronous>, transform_indices = @transform_10, window_bounds = array<i64: 2, 32, 128>}, {pipeline_mode = #tpu.pipeline_mode<synchronous>, transform_indices = @transform_11, window_bounds = array<i64: 2, 128, 32>}, {pipeline_mode = #tpu.pipeline_mode<synchronous>, transform_indices = @transform_12, window_bounds = array<i64: 32, 128>}, {pipeline_mode = #tpu.pipeline_mode<synchronous>, transform_indices = @transform_13, window_bounds = array<i64: 6, 128>}, {pipeline_mode = #tpu.pipeline_mode<synchronous>, transform_indices = @transform_14, window_bounds = array<i64: 24, 128>}, {pipeline_mode = #tpu.pipeline_mode<synchronous>, transform_indices = @transform_15, window_bounds = array<i64: 2, 128>}, {pipeline_mode = #tpu.pipeline_mode<synchronous>, transform_indices = @transform_16, window_bounds = array<i64: 2, 128>}]} {
    %c0 = arith.constant 0 : index
    %c0_0 = arith.constant 0 : index
    %0 = vector.load %arg15[%c0, %c0_0] : memref<24x128xf32, #tpu.memory_space<vmem>>, vector<24x128xf32>
    %c0_1 = arith.constant 0 : index
    %c0_2 = arith.constant 0 : index
    %1 = vector.load %arg4[%c0_1, %c0_2] : memref<2x16xf32, #tpu.memory_space<vmem>>, vector<2x16xf32>
    %c0_3 = arith.constant 0 : index
    %c0_4 = arith.constant 0 : index
    %2 = vector.load %arg1[%c0_3, %c0_4] : memref<16x6xf32, #tpu.memory_space<vmem>>, vector<16x6xf32>
    %cst = arith.constant dense<0.000000e+00> : vector<2x6xf32>
    %3 = tpu.matmul %1, %2, %cst {dimension_numbers = #tpu.dot_dimension_numbers<[1], [0], [0], [1], [0, 0, 1, 1], [], []>} : vector<2x16xf32>, vector<16x6xf32>, vector<2x6xf32> -> vector<2x6xf32>
    %4 = vector.extract_strided_slice %0 {offsets = [19, 0], sizes = [1, 128], strides = [1, 1]} : vector<24x128xf32> to vector<1x128xf32>
    %c0_5 = arith.constant 0 : index
    %c0_6 = arith.constant 0 : index
    %5 = vector.load %arg14[%c0_5, %c0_6] : memref<6x128xf32, #tpu.memory_space<vmem>>, vector<6x128xf32>
    %cst_7 = arith.constant dense<0.000000e+00> : vector<2x128xf32>
    %6 = tpu.matmul %3, %5, %cst_7 {dimension_numbers = #tpu.dot_dimension_numbers<[1], [0], [0], [1], [0, 0, 1, 1], [], []>} : vector<2x6xf32>, vector<6x128xf32>, vector<2x128xf32> -> vector<2x128xf32>
    %7 = vector.broadcast %4 : vector<1x128xf32> to vector<2x128xf32>
    %8 = arith.addf %6, %7 : vector<2x128xf32>
    %c0_8 = arith.constant 0 : index
    %c0_9 = arith.constant 0 : index
    %9 = vector.load %arg16[%c0_8, %c0_9] : memref<2x128xf32, #tpu.memory_space<vmem>>, vector<2x128xf32>
    tpu.vector_store %arg16[%c0_8, %c0_9], %8 {strides = array<i32>} : memref<2x128xf32, #tpu.memory_space<vmem>>, vector<2x128xf32>,
    %c0_10 = arith.constant 0 : index
    %c0_11 = arith.constant 0 : index
    %10 = vector.load %arg2[%c0_10, %c0_11] : memref<16x192xf32, #tpu.memory_space<vmem>>, vector<16x192xf32>
    %c0_12 = arith.constant 0 : index
    %c0_13 = arith.constant 0 : index
    %11 = vector.load %arg8[%c0_12, %c0_13] : memref<192x32xf32, #tpu.memory_space<vmem>>, vector<192x32xf32>
    %cst_14 = arith.constant dense<0.000000e+00> : vector<16x32xf32>
    %12 = tpu.matmul %10, %11, %cst_14 {dimension_numbers = #tpu.dot_dimension_numbers<[1], [0], [0], [1], [0, 0, 1, 1], [], []>} : vector<16x192xf32>, vector<192x32xf32>, vector<16x32xf32> -> vector<16x32xf32>
    %c0_15 = arith.constant 0 : index
    %c0_16 = arith.constant 0 : index
    %13 = vector.load %arg3[%c0_15, %c0_16] : memref<16x32xf32, #tpu.memory_space<vmem>>, vector<16x32xf32>
    %14 = arith.addf %12, %13 : vector<16x32xf32>
    %c0_17 = arith.constant 0 : index
    %c0_18 = arith.constant 0 : index
    %15 = vector.load %arg6[%c0_17, %c0_18] : memref<64x16xf32, #tpu.memory_space<vmem>>, vector<64x16xf32>
    %c0_19 = arith.constant 0 : index
    %c0_20 = arith.constant 0 : index
    %16 = vector.load %arg7[%c0_19, %c0_20] : memref<64x32xf32, #tpu.memory_space<vmem>>, vector<64x32xf32>
    %17 = vector.extract_strided_slice %0 {offsets = [0, 0], sizes = [1, 32], strides = [1, 1]} : vector<24x128xf32> to vector<1x32xf32>
    %18 = vector.extract_strided_slice %0 {offsets = [1, 0], sizes = [1, 32], strides = [1, 1]} : vector<24x128xf32> to vector<1x32xf32>
    %19 = vector.extract_strided_slice %0 {offsets = [2, 0], sizes = [1, 96], strides = [1, 1]} : vector<24x128xf32> to vector<1x96xf32>
    %20 = vector.extract_strided_slice %0 {offsets = [3, 0], sizes = [1, 32], strides = [1, 1]} : vector<24x128xf32> to vector<1x32xf32>
    %21 = vector.extract_strided_slice %0 {offsets = [4, 0], sizes = [1, 32], strides = [1, 1]} : vector<24x128xf32> to vector<1x32xf32>
    %22 = vector.extract_strided_slice %0 {offsets = [5, 0], sizes = [1, 32], strides = [1, 1]} : vector<24x128xf32> to vector<1x32xf32>
    %23 = vector.extract_strided_slice %0 {offsets = [6, 0], sizes = [1, 128], strides = [1, 1]} : vector<24x128xf32> to vector<1x128xf32>
    %24 = vector.extract_strided_slice %0 {offsets = [7, 0], sizes = [1, 32], strides = [1, 1]} : vector<24x128xf32> to vector<1x32xf32>
    %cst_21 = arith.constant dense<0.000000e+00> : vector<16xf32>
    %25 = vector.multi_reduction <add>, %14, %cst_21 [1] : vector<16x32xf32> to vector<16xf32>
    %26 = vector.shape_cast %25 : vector<16xf32> to vector<16x1xf32>
    %cst_22 = arith.constant 3.200000e+01 : f32
    %27 = vector.broadcast %cst_22 : f32 to vector<16x1xf32>
    %28 = arith.divf %26, %27 : vector<16x1xf32>
    %29 = vector.broadcast %28 : vector<16x1xf32> to vector<16x32xf32>
    %30 = arith.subf %14, %29 : vector<16x32xf32>
    %31 = arith.mulf %30, %30 : vector<16x32xf32>
    %cst_23 = arith.constant dense<0.000000e+00> : vector<16xf32>
    %32 = vector.multi_reduction <add>, %31, %cst_23 [1] : vector<16x32xf32> to vector<16xf32>
    %33 = vector.shape_cast %32 : vector<16xf32> to vector<16x1xf32>
    %cst_24 = arith.constant 3.200000e+01 : f32
    %34 = vector.broadcast %cst_24 : f32 to vector<16x1xf32>
    %35 = arith.divf %33, %34 : vector<16x1xf32>
    %36 = vector.broadcast %28 : vector<16x1xf32> to vector<16x32xf32>
    %37 = arith.subf %14, %36 : vector<16x32xf32>
    %cst_25 = arith.constant 9.99999996E-13 : f32
    %38 = vector.broadcast %cst_25 : f32 to vector<16x1xf32>
    %39 = arith.addf %35, %38 : vector<16x1xf32>
    %40 = math.rsqrt %39 : vector<16x1xf32>
    %41 = vector.broadcast %40 : vector<16x1xf32> to vector<16x32xf32>
    %42 = arith.mulf %37, %41 : vector<16x32xf32>
    %43 = vector.broadcast %17 : vector<1x32xf32> to vector<16x32xf32>
    %44 = arith.mulf %42, %43 : vector<16x32xf32>
    %45 = vector.broadcast %18 : vector<1x32xf32> to vector<16x32xf32>
    %46 = arith.addf %44, %45 : vector<16x32xf32>
    %c0_26 = arith.constant 0 : index
    %c0_27 = arith.constant 0 : index
    %c0_28 = arith.constant 0 : index
    %47 = vector.load %arg9[%c0_26, %c0_27, %c0_28] : memref<2x32x96xf32, #tpu.memory_space<vmem>>, vector<1x32x96xf32>
    %48 = vector.shape_cast %47 : vector<1x32x96xf32> to vector<32x96xf32>
    %cst_29 = arith.constant dense<0.000000e+00> : vector<16x96xf32>
    %49 = tpu.matmul %46, %48, %cst_29 {dimension_numbers = #tpu.dot_dimension_numbers<[1], [0], [0], [1], [0, 0, 1, 1], [], []>} : vector<16x32xf32>, vector<32x96xf32>, vector<16x96xf32> -> vector<16x96xf32>
    %50 = vector.broadcast %19 : vector<1x96xf32> to vector<16x96xf32>
    %51 = arith.addf %49, %50 : vector<16x96xf32>
    %52 = vector.extract_strided_slice %51 {offsets = [0, 0], sizes = [16, 32], strides = [1, 1]} : vector<16x96xf32> to vector<16x32xf32>
    %53 = vector.extract_strided_slice %51 {offsets = [0, 32], sizes = [16, 32], strides = [1, 1]} : vector<16x96xf32> to vector<16x32xf32>
    %54 = vector.extract_strided_slice %51 {offsets = [0, 64], sizes = [16, 32], strides = [1, 1]} : vector<16x96xf32> to vector<16x32xf32>
    %55 = tpu.concatenate %52, %52, %52, %52 in 0 : vector<16x32xf32>, vector<16x32xf32>, vector<16x32xf32>, vector<16x32xf32> -> vector<64x32xf32>
    %56 = arith.mulf %55, %16 : vector<64x32xf32>
    %cst_30 = arith.constant dense<0.000000e+00> : vector<64x16xf32>
    %57 = tpu.matmul %56, %53, %cst_30 {dimension_numbers = #tpu.dot_dimension_numbers<[1], [1], [0], [0], [0, 0, 1, 0], [], []>} : vector<64x32xf32>, vector<16x32xf32>, vector<64x16xf32> -> vector<64x16xf32>
    %58 = arith.addf %57, %15 : vector<64x16xf32>
    %cst_31 = arith.constant dense<0xFF800000> : vector<64xf32>
    %59 = vector.multi_reduction <maximumf>, %58, %cst_31 [1] : vector<64x16xf32> to vector<64xf32>
    %60 = vector.shape_cast %59 : vector<64xf32> to vector<64x1xf32>
    %61 = vector.broadcast %60 : vector<64x1xf32> to vector<64x16xf32>
    %62 = arith.subf %58, %61 : vector<64x16xf32>
    %63 = math.exp %62 : vector<64x16xf32>
    %cst_32 = arith.constant dense<0.000000e+00> : vector<64xf32>
    %64 = vector.multi_reduction <add>, %63, %cst_32 [1] : vector<64x16xf32> to vector<64xf32>
    %65 = vector.shape_cast %64 : vector<64xf32> to vector<64x1xf32>
    %66 = tpu.reciprocal %65 {approx = true} : vector<64x1xf32> -> vector<64x1xf32>
    %67 = vector.broadcast %66 : vector<64x1xf32> to vector<64x16xf32>
    %68 = arith.mulf %63, %67 : vector<64x16xf32>
    %cst_33 = arith.constant dense<0.000000e+00> : vector<64x32xf32>
    %69 = tpu.matmul %68, %54, %cst_33 {dimension_numbers = #tpu.dot_dimension_numbers<[1], [0], [0], [1], [0, 0, 1, 1], [], []>} : vector<64x16xf32>, vector<16x32xf32>, vector<64x32xf32> -> vector<64x32xf32>
    %70 = arith.mulf %69, %16 : vector<64x32xf32>
    %71 = vector.extract_strided_slice %70 {offsets = [0, 0], sizes = [16, 32], strides = [1, 1]} : vector<64x32xf32> to vector<16x32xf32>
    %72 = vector.extract_strided_slice %70 {offsets = [16, 0], sizes = [16, 32], strides = [1, 1]} : vector<64x32xf32> to vector<16x32xf32>
    %73 = arith.addf %71, %72 : vector<16x32xf32>
    %74 = vector.extract_strided_slice %70 {offsets = [32, 0], sizes = [16, 32], strides = [1, 1]} : vector<64x32xf32> to vector<16x32xf32>
    %75 = arith.addf %73, %74 : vector<16x32xf32>
    %76 = vector.extract_strided_slice %70 {offsets = [48, 0], sizes = [16, 32], strides = [1, 1]} : vector<64x32xf32> to vector<16x32xf32>
    %77 = arith.addf %75, %76 : vector<16x32xf32>
    %c0_34 = arith.constant 0 : index
    %c0_35 = arith.constant 0 : index
    %c0_36 = arith.constant 0 : index
    %78 = vector.load %arg10[%c0_34, %c0_35, %c0_36] : memref<2x32x32xf32, #tpu.memory_space<vmem>>, vector<1x32x32xf32>
    %79 = vector.shape_cast %78 : vector<1x32x32xf32> to vector<32x32xf32>
    %cst_37 = arith.constant dense<0.000000e+00> : vector<16x32xf32>
    %80 = tpu.matmul %77, %79, %cst_37 {dimension_numbers = #tpu.dot_dimension_numbers<[1], [0], [0], [1], [0, 0, 1, 1], [], []>} : vector<16x32xf32>, vector<32x32xf32>, vector<16x32xf32> -> vector<16x32xf32>
    %81 = arith.addf %14, %80 : vector<16x32xf32>
    %82 = vector.broadcast %20 : vector<1x32xf32> to vector<16x32xf32>
    %83 = arith.addf %81, %82 : vector<16x32xf32>
    %cst_38 = arith.constant dense<0.000000e+00> : vector<16xf32>
    %84 = vector.multi_reduction <add>, %83, %cst_38 [1] : vector<16x32xf32> to vector<16xf32>
    %85 = vector.shape_cast %84 : vector<16xf32> to vector<16x1xf32>
    %cst_39 = arith.constant 3.200000e+01 : f32
    %86 = vector.broadcast %cst_39 : f32 to vector<16x1xf32>
    %87 = arith.divf %85, %86 : vector<16x1xf32>
    %88 = vector.broadcast %87 : vector<16x1xf32> to vector<16x32xf32>
    %89 = arith.subf %83, %88 : vector<16x32xf32>
    %90 = arith.mulf %89, %89 : vector<16x32xf32>
    %cst_40 = arith.constant dense<0.000000e+00> : vector<16xf32>
    %91 = vector.multi_reduction <add>, %90, %cst_40 [1] : vector<16x32xf32> to vector<16xf32>
    %92 = vector.shape_cast %91 : vector<16xf32> to vector<16x1xf32>
    %cst_41 = arith.constant 3.200000e+01 : f32
    %93 = vector.broadcast %cst_41 : f32 to vector<16x1xf32>
    %94 = arith.divf %92, %93 : vector<16x1xf32>
    %95 = vector.broadcast %87 : vector<16x1xf32> to vector<16x32xf32>
    %96 = arith.subf %83, %95 : vector<16x32xf32>
    %cst_42 = arith.constant 9.99999996E-13 : f32
    %97 = vector.broadcast %cst_42 : f32 to vector<16x1xf32>
    %98 = arith.addf %94, %97 : vector<16x1xf32>
    %99 = math.rsqrt %98 : vector<16x1xf32>
    %100 = vector.broadcast %99 : vector<16x1xf32> to vector<16x32xf32>
    %101 = arith.mulf %96, %100 : vector<16x32xf32>
    %102 = vector.broadcast %21 : vector<1x32xf32> to vector<16x32xf32>
    %103 = arith.mulf %101, %102 : vector<16x32xf32>
    %104 = vector.broadcast %22 : vector<1x32xf32> to vector<16x32xf32>
    %105 = arith.addf %103, %104 : vector<16x32xf32>
    %c0_43 = arith.constant 0 : index
    %c0_44 = arith.constant 0 : index
    %c0_45 = arith.constant 0 : index
    %106 = vector.load %arg11[%c0_43, %c0_44, %c0_45] : memref<2x32x128xf32, #tpu.memory_space<vmem>>, vector<1x32x128xf32>
    %107 = vector.shape_cast %106 : vector<1x32x128xf32> to vector<32x128xf32>
    %cst_46 = arith.constant dense<0.000000e+00> : vector<16x128xf32>
    %108 = tpu.matmul %105, %107, %cst_46 {dimension_numbers = #tpu.dot_dimension_numbers<[1], [0], [0], [1], [0, 0, 1, 1], [], []>} : vector<16x32xf32>, vector<32x128xf32>, vector<16x128xf32> -> vector<16x128xf32>
    %109 = vector.broadcast %23 : vector<1x128xf32> to vector<16x128xf32>
    %110 = arith.addf %108, %109 : vector<16x128xf32>
    %111 = arith.mulf %110, %110 : vector<16x128xf32>
    %112 = arith.mulf %110, %111 : vector<16x128xf32>
    %cst_47 = arith.constant 4.471500e-02 : f32
    %113 = vector.broadcast %cst_47 : f32 to vector<16x128xf32>
    %114 = arith.mulf %113, %112 : vector<16x128xf32>
    %115 = arith.addf %110, %114 : vector<16x128xf32>
    %cst_48 = arith.constant 0.797884583 : f32
    %116 = vector.broadcast %cst_48 : f32 to vector<16x128xf32>
    %117 = arith.mulf %116, %115 : vector<16x128xf32>
    %118 = math.tanh %117 : vector<16x128xf32>
    %cst_49 = arith.constant 1.000000e+00 : f32
    %119 = vector.broadcast %cst_49 : f32 to vector<16x128xf32>
    %120 = arith.addf %119, %118 : vector<16x128xf32>
    %cst_50 = arith.constant 5.000000e-01 : f32
    %121 = vector.broadcast %cst_50 : f32 to vector<16x128xf32>
    %122 = arith.mulf %121, %120 : vector<16x128xf32>
    %123 = arith.mulf %110, %122 : vector<16x128xf32>
    %c0_51 = arith.constant 0 : index
    %c0_52 = arith.constant 0 : index
    %c0_53 = arith.constant 0 : index
    %124 = vector.load %arg12[%c0_51, %c0_52, %c0_53] : memref<2x128x32xf32, #tpu.memory_space<vmem>>, vector<1x128x32xf32>
    %125 = vector.shape_cast %124 : vector<1x128x32xf32> to vector<128x32xf32>
    %cst_54 = arith.constant dense<0.000000e+00> : vector<16x32xf32>
    %126 = tpu.matmul %123, %125, %cst_54 {dimension_numbers = #tpu.dot_dimension_numbers<[1], [0], [0], [1], [0, 0, 1, 1], [], []>} : vector<16x128xf32>, vector<128x32xf32>, vector<16x32xf32> -> vector<16x32xf32>
    %127 = arith.addf %83, %126 : vector<16x32xf32>
    %128 = vector.broadcast %24 : vector<1x32xf32> to vector<16x32xf32>
    %129 = arith.addf %127, %128 : vector<16x32xf32>
    %130 = vector.extract_strided_slice %0 {offsets = [8, 0], sizes = [1, 32], strides = [1, 1]} : vector<24x128xf32> to vector<1x32xf32>
    %131 = vector.extract_strided_slice %0 {offsets = [9, 0], sizes = [1, 32], strides = [1, 1]} : vector<24x128xf32> to vector<1x32xf32>
    %132 = vector.extract_strided_slice %0 {offsets = [10, 0], sizes = [1, 96], strides = [1, 1]} : vector<24x128xf32> to vector<1x96xf32>
    %133 = vector.extract_strided_slice %0 {offsets = [11, 0], sizes = [1, 32], strides = [1, 1]} : vector<24x128xf32> to vector<1x32xf32>
    %134 = vector.extract_strided_slice %0 {offsets = [12, 0], sizes = [1, 32], strides = [1, 1]} : vector<24x128xf32> to vector<1x32xf32>
    %135 = vector.extract_strided_slice %0 {offsets = [13, 0], sizes = [1, 32], strides = [1, 1]} : vector<24x128xf32> to vector<1x32xf32>
    %136 = vector.extract_strided_slice %0 {offsets = [14, 0], sizes = [1, 128], strides = [1, 1]} : vector<24x128xf32> to vector<1x128xf32>
    %137 = vector.extract_strided_slice %0 {offsets = [15, 0], sizes = [1, 32], strides = [1, 1]} : vector<24x128xf32> to vector<1x32xf32>
    %cst_55 = arith.constant dense<0.000000e+00> : vector<16xf32>
    %138 = vector.multi_reduction <add>, %129, %cst_55 [1] : vector<16x32xf32> to vector<16xf32>
    %139 = vector.shape_cast %138 : vector<16xf32> to vector<16x1xf32>
    %cst_56 = arith.constant 3.200000e+01 : f32
    %140 = vector.broadcast %cst_56 : f32 to vector<16x1xf32>
    %141 = arith.divf %139, %140 : vector<16x1xf32>
    %142 = vector.broadcast %141 : vector<16x1xf32> to vector<16x32xf32>
    %143 = arith.subf %129, %142 : vector<16x32xf32>
    %144 = arith.mulf %143, %143 : vector<16x32xf32>
    %cst_57 = arith.constant dense<0.000000e+00> : vector<16xf32>
    %145 = vector.multi_reduction <add>, %144, %cst_57 [1] : vector<16x32xf32> to vector<16xf32>
    %146 = vector.shape_cast %145 : vector<16xf32> to vector<16x1xf32>
    %cst_58 = arith.constant 3.200000e+01 : f32
    %147 = vector.broadcast %cst_58 : f32 to vector<16x1xf32>
    %148 = arith.divf %146, %147 : vector<16x1xf32>
    %149 = vector.broadcast %141 : vector<16x1xf32> to vector<16x32xf32>
    %150 = arith.subf %129, %149 : vector<16x32xf32>
    %cst_59 = arith.constant 9.99999996E-13 : f32
    %151 = vector.broadcast %cst_59 : f32 to vector<16x1xf32>
    %152 = arith.addf %148, %151 : vector<16x1xf32>
    %153 = math.rsqrt %152 : vector<16x1xf32>
    %154 = vector.broadcast %153 : vector<16x1xf32> to vector<16x32xf32>
    %155 = arith.mulf %150, %154 : vector<16x32xf32>
    %156 = vector.broadcast %130 : vector<1x32xf32> to vector<16x32xf32>
    %157 = arith.mulf %155, %156 : vector<16x32xf32>
    %158 = vector.broadcast %131 : vector<1x32xf32> to vector<16x32xf32>
    %159 = arith.addf %157, %158 : vector<16x32xf32>
    %c1 = arith.constant 1 : index
    %c0_60 = arith.constant 0 : index
    %c0_61 = arith.constant 0 : index
    %160 = vector.load %arg9[%c1, %c0_60, %c0_61] : memref<2x32x96xf32, #tpu.memory_space<vmem>>, vector<1x32x96xf32>
    %161 = vector.shape_cast %160 : vector<1x32x96xf32> to vector<32x96xf32>
    %cst_62 = arith.constant dense<0.000000e+00> : vector<16x96xf32>
    %162 = tpu.matmul %159, %161, %cst_62 {dimension_numbers = #tpu.dot_dimension_numbers<[1], [0], [0], [1], [0, 0, 1, 1], [], []>} : vector<16x32xf32>, vector<32x96xf32>, vector<16x96xf32> -> vector<16x96xf32>
    %163 = vector.broadcast %132 : vector<1x96xf32> to vector<16x96xf32>
    %164 = arith.addf %162, %163 : vector<16x96xf32>
    %165 = vector.extract_strided_slice %164 {offsets = [0, 0], sizes = [16, 32], strides = [1, 1]} : vector<16x96xf32> to vector<16x32xf32>
    %166 = vector.extract_strided_slice %164 {offsets = [0, 32], sizes = [16, 32], strides = [1, 1]} : vector<16x96xf32> to vector<16x32xf32>
    %167 = vector.extract_strided_slice %164 {offsets = [0, 64], sizes = [16, 32], strides = [1, 1]} : vector<16x96xf32> to vector<16x32xf32>
    %168 = tpu.concatenate %165, %165, %165, %165 in 0 : vector<16x32xf32>, vector<16x32xf32>, vector<16x32xf32>, vector<16x32xf32> -> vector<64x32xf32>
    %169 = arith.mulf %168, %16 : vector<64x32xf32>
    %cst_63 = arith.constant dense<0.000000e+00> : vector<64x16xf32>
    %170 = tpu.matmul %169, %166, %cst_63 {dimension_numbers = #tpu.dot_dimension_numbers<[1], [1], [0], [0], [0, 0, 1, 0], [], []>} : vector<64x32xf32>, vector<16x32xf32>, vector<64x16xf32> -> vector<64x16xf32>
    %171 = arith.addf %170, %15 : vector<64x16xf32>
    %cst_64 = arith.constant dense<0xFF800000> : vector<64xf32>
    %172 = vector.multi_reduction <maximumf>, %171, %cst_64 [1] : vector<64x16xf32> to vector<64xf32>
    %173 = vector.shape_cast %172 : vector<64xf32> to vector<64x1xf32>
    %174 = vector.broadcast %173 : vector<64x1xf32> to vector<64x16xf32>
    %175 = arith.subf %171, %174 : vector<64x16xf32>
    %176 = math.exp %175 : vector<64x16xf32>
    %cst_65 = arith.constant dense<0.000000e+00> : vector<64xf32>
    %177 = vector.multi_reduction <add>, %176, %cst_65 [1] : vector<64x16xf32> to vector<64xf32>
    %178 = vector.shape_cast %177 : vector<64xf32> to vector<64x1xf32>
    %179 = tpu.reciprocal %178 {approx = true} : vector<64x1xf32> -> vector<64x1xf32>
    %180 = vector.broadcast %179 : vector<64x1xf32> to vector<64x16xf32>
    %181 = arith.mulf %176, %180 : vector<64x16xf32>
    %cst_66 = arith.constant dense<0.000000e+00> : vector<64x32xf32>
    %182 = tpu.matmul %181, %167, %cst_66 {dimension_numbers = #tpu.dot_dimension_numbers<[1], [0], [0], [1], [0, 0, 1, 1], [], []>} : vector<64x16xf32>, vector<16x32xf32>, vector<64x32xf32> -> vector<64x32xf32>
    %183 = arith.mulf %182, %16 : vector<64x32xf32>
    %184 = vector.extract_strided_slice %183 {offsets = [0, 0], sizes = [16, 32], strides = [1, 1]} : vector<64x32xf32> to vector<16x32xf32>
    %185 = vector.extract_strided_slice %183 {offsets = [16, 0], sizes = [16, 32], strides = [1, 1]} : vector<64x32xf32> to vector<16x32xf32>
    %186 = arith.addf %184, %185 : vector<16x32xf32>
    %187 = vector.extract_strided_slice %183 {offsets = [32, 0], sizes = [16, 32], strides = [1, 1]} : vector<64x32xf32> to vector<16x32xf32>
    %188 = arith.addf %186, %187 : vector<16x32xf32>
    %189 = vector.extract_strided_slice %183 {offsets = [48, 0], sizes = [16, 32], strides = [1, 1]} : vector<64x32xf32> to vector<16x32xf32>
    %190 = arith.addf %188, %189 : vector<16x32xf32>
    %c1_67 = arith.constant 1 : index
    %c0_68 = arith.constant 0 : index
    %c0_69 = arith.constant 0 : index
    %191 = vector.load %arg10[%c1_67, %c0_68, %c0_69] : memref<2x32x32xf32, #tpu.memory_space<vmem>>, vector<1x32x32xf32>
    %192 = vector.shape_cast %191 : vector<1x32x32xf32> to vector<32x32xf32>
    %cst_70 = arith.constant dense<0.000000e+00> : vector<16x32xf32>
    %193 = tpu.matmul %190, %192, %cst_70 {dimension_numbers = #tpu.dot_dimension_numbers<[1], [0], [0], [1], [0, 0, 1, 1], [], []>} : vector<16x32xf32>, vector<32x32xf32>, vector<16x32xf32> -> vector<16x32xf32>
    %194 = arith.addf %129, %193 : vector<16x32xf32>
    %195 = vector.broadcast %133 : vector<1x32xf32> to vector<16x32xf32>
    %196 = arith.addf %194, %195 : vector<16x32xf32>
    %cst_71 = arith.constant dense<0.000000e+00> : vector<16xf32>
    %197 = vector.multi_reduction <add>, %196, %cst_71 [1] : vector<16x32xf32> to vector<16xf32>
    %198 = vector.shape_cast %197 : vector<16xf32> to vector<16x1xf32>
    %cst_72 = arith.constant 3.200000e+01 : f32
    %199 = vector.broadcast %cst_72 : f32 to vector<16x1xf32>
    %200 = arith.divf %198, %199 : vector<16x1xf32>
    %201 = vector.broadcast %200 : vector<16x1xf32> to vector<16x32xf32>
    %202 = arith.subf %196, %201 : vector<16x32xf32>
    %203 = arith.mulf %202, %202 : vector<16x32xf32>
    %cst_73 = arith.constant dense<0.000000e+00> : vector<16xf32>
    %204 = vector.multi_reduction <add>, %203, %cst_73 [1] : vector<16x32xf32> to vector<16xf32>
    %205 = vector.shape_cast %204 : vector<16xf32> to vector<16x1xf32>
    %cst_74 = arith.constant 3.200000e+01 : f32
    %206 = vector.broadcast %cst_74 : f32 to vector<16x1xf32>
    %207 = arith.divf %205, %206 : vector<16x1xf32>
    %208 = vector.broadcast %200 : vector<16x1xf32> to vector<16x32xf32>
    %209 = arith.subf %196, %208 : vector<16x32xf32>
    %cst_75 = arith.constant 9.99999996E-13 : f32
    %210 = vector.broadcast %cst_75 : f32 to vector<16x1xf32>
    %211 = arith.addf %207, %210 : vector<16x1xf32>
    %212 = math.rsqrt %211 : vector<16x1xf32>
    %213 = vector.broadcast %212 : vector<16x1xf32> to vector<16x32xf32>
    %214 = arith.mulf %209, %213 : vector<16x32xf32>
    %215 = vector.broadcast %134 : vector<1x32xf32> to vector<16x32xf32>
    %216 = arith.mulf %214, %215 : vector<16x32xf32>
    %217 = vector.broadcast %135 : vector<1x32xf32> to vector<16x32xf32>
    %218 = arith.addf %216, %217 : vector<16x32xf32>
    %c1_76 = arith.constant 1 : index
    %c0_77 = arith.constant 0 : index
    %c0_78 = arith.constant 0 : index
    %219 = vector.load %arg11[%c1_76, %c0_77, %c0_78] : memref<2x32x128xf32, #tpu.memory_space<vmem>>, vector<1x32x128xf32>
    %220 = vector.shape_cast %219 : vector<1x32x128xf32> to vector<32x128xf32>
    %cst_79 = arith.constant dense<0.000000e+00> : vector<16x128xf32>
    %221 = tpu.matmul %218, %220, %cst_79 {dimension_numbers = #tpu.dot_dimension_numbers<[1], [0], [0], [1], [0, 0, 1, 1], [], []>} : vector<16x32xf32>, vector<32x128xf32>, vector<16x128xf32> -> vector<16x128xf32>
    %222 = vector.broadcast %136 : vector<1x128xf32> to vector<16x128xf32>
    %223 = arith.addf %221, %222 : vector<16x128xf32>
    %224 = arith.mulf %223, %223 : vector<16x128xf32>
    %225 = arith.mulf %223, %224 : vector<16x128xf32>
    %cst_80 = arith.constant 4.471500e-02 : f32
    %226 = vector.broadcast %cst_80 : f32 to vector<16x128xf32>
    %227 = arith.mulf %226, %225 : vector<16x128xf32>
    %228 = arith.addf %223, %227 : vector<16x128xf32>
    %cst_81 = arith.constant 0.797884583 : f32
    %229 = vector.broadcast %cst_81 : f32 to vector<16x128xf32>
    %230 = arith.mulf %229, %228 : vector<16x128xf32>
    %231 = math.tanh %230 : vector<16x128xf32>
    %cst_82 = arith.constant 1.000000e+00 : f32
    %232 = vector.broadcast %cst_82 : f32 to vector<16x128xf32>
    %233 = arith.addf %232, %231 : vector<16x128xf32>
    %cst_83 = arith.constant 5.000000e-01 : f32
    %234 = vector.broadcast %cst_83 : f32 to vector<16x128xf32>
    %235 = arith.mulf %234, %233 : vector<16x128xf32>
    %236 = arith.mulf %223, %235 : vector<16x128xf32>
    %c1_84 = arith.constant 1 : index
    %c0_85 = arith.constant 0 : index
    %c0_86 = arith.constant 0 : index
    %237 = vector.load %arg12[%c1_84, %c0_85, %c0_86] : memref<2x128x32xf32, #tpu.memory_space<vmem>>, vector<1x128x32xf32>
    %238 = vector.shape_cast %237 : vector<1x128x32xf32> to vector<128x32xf32>
    %cst_87 = arith.constant dense<0.000000e+00> : vector<16x32xf32>
    %239 = tpu.matmul %236, %238, %cst_87 {dimension_numbers = #tpu.dot_dimension_numbers<[1], [0], [0], [1], [0, 0, 1, 1], [], []>} : vector<16x128xf32>, vector<128x32xf32>, vector<16x32xf32> -> vector<16x32xf32>
    %240 = arith.addf %196, %239 : vector<16x32xf32>
    %241 = vector.broadcast %137 : vector<1x32xf32> to vector<16x32xf32>
    %242 = arith.addf %240, %241 : vector<16x32xf32>
    %243 = vector.extract_strided_slice %0 {offsets = [16, 0], sizes = [1, 32], strides = [1, 1]} : vector<24x128xf32> to vector<1x32xf32>
    %244 = vector.extract_strided_slice %0 {offsets = [17, 0], sizes = [1, 32], strides = [1, 1]} : vector<24x128xf32> to vector<1x32xf32>
    %245 = vector.extract_strided_slice %0 {offsets = [18, 0], sizes = [1, 128], strides = [1, 1]} : vector<24x128xf32> to vector<1x128xf32>
    %cst_88 = arith.constant dense<0.000000e+00> : vector<16xf32>
    %246 = vector.multi_reduction <add>, %242, %cst_88 [1] : vector<16x32xf32> to vector<16xf32>
    %247 = vector.shape_cast %246 : vector<16xf32> to vector<16x1xf32>
    %cst_89 = arith.constant 3.200000e+01 : f32
    %248 = vector.broadcast %cst_89 : f32 to vector<16x1xf32>
    %249 = arith.divf %247, %248 : vector<16x1xf32>
    %250 = vector.broadcast %249 : vector<16x1xf32> to vector<16x32xf32>
    %251 = arith.subf %242, %250 : vector<16x32xf32>
    %252 = arith.mulf %251, %251 : vector<16x32xf32>
    %cst_90 = arith.constant dense<0.000000e+00> : vector<16xf32>
    %253 = vector.multi_reduction <add>, %252, %cst_90 [1] : vector<16x32xf32> to vector<16xf32>
    %254 = vector.shape_cast %253 : vector<16xf32> to vector<16x1xf32>
    %cst_91 = arith.constant 3.200000e+01 : f32
    %255 = vector.broadcast %cst_91 : f32 to vector<16x1xf32>
    %256 = arith.divf %254, %255 : vector<16x1xf32>
    %257 = vector.broadcast %249 : vector<16x1xf32> to vector<16x32xf32>
    %258 = arith.subf %242, %257 : vector<16x32xf32>
    %cst_92 = arith.constant 9.99999996E-13 : f32
    %259 = vector.broadcast %cst_92 : f32 to vector<16x1xf32>
    %260 = arith.addf %256, %259 : vector<16x1xf32>
    %261 = math.rsqrt %260 : vector<16x1xf32>
    %262 = vector.broadcast %261 : vector<16x1xf32> to vector<16x32xf32>
    %263 = arith.mulf %258, %262 : vector<16x32xf32>
    %264 = vector.broadcast %243 : vector<1x32xf32> to vector<16x32xf32>
    %265 = arith.mulf %263, %264 : vector<16x32xf32>
    %266 = vector.broadcast %244 : vector<1x32xf32> to vector<16x32xf32>
    %267 = arith.addf %265, %266 : vector<16x32xf32>
    %c0_93 = arith.constant 0 : index
    %c0_94 = arith.constant 0 : index
    %268 = vector.load %arg5[%c0_93, %c0_94] : memref<2x16xf32, #tpu.memory_space<vmem>>, vector<2x16xf32>
    %cst_95 = arith.constant dense<0.000000e+00> : vector<2x32xf32>
    %269 = tpu.matmul %268, %267, %cst_95 {dimension_numbers = #tpu.dot_dimension_numbers<[1], [0], [0], [1], [0, 0, 1, 1], [], []>} : vector<2x16xf32>, vector<16x32xf32>, vector<2x32xf32> -> vector<2x32xf32>
    %c0_96 = arith.constant 0 : index
    %c0_97 = arith.constant 0 : index
    %270 = vector.load %arg13[%c0_96, %c0_97] : memref<32x128xf32, #tpu.memory_space<vmem>>, vector<32x128xf32>
    %cst_98 = arith.constant dense<0.000000e+00> : vector<2x128xf32>
    %271 = tpu.matmul %269, %270, %cst_98 {dimension_numbers = #tpu.dot_dimension_numbers<[1], [0], [0], [1], [0, 0, 1, 1], [], []>} : vector<2x32xf32>, vector<32x128xf32>, vector<2x128xf32> -> vector<2x128xf32>
    %272 = vector.broadcast %245 : vector<1x128xf32> to vector<2x128xf32>
    %273 = arith.addf %271, %272 : vector<2x128xf32>
    %c0_99 = arith.constant 0 : index
    %c0_100 = arith.constant 0 : index
    %274 = vector.load %arg17[%c0_99, %c0_100] : memref<2x128xf32, #tpu.memory_space<vmem>>, vector<2x128xf32>
    tpu.vector_store %arg17[%c0_99, %c0_100], %273 {strides = array<i32>} : memref<2x128xf32, #tpu.memory_space<vmem>>, vector<2x128xf32>,
    return
  }
  func.func @transform_0(%arg0: i32) -> (i32, i32) {
    %c0_i32 = arith.constant 0 : i32
    %c0_i32_0 = arith.constant 0 : i32
    %c0_i32_1 = arith.constant 0 : i32
    return %c0_i32, %c0_i32_0 : i32, i32
  }
  func.func @transform_1(%arg0: i32) -> (i32, i32) {
    %c0_i32 = arith.constant 0 : i32
    %c0_i32_0 = arith.constant 0 : i32
    %c0_i32_1 = arith.constant 0 : i32
    return %c0_i32, %c0_i32_0 : i32, i32
  }
  func.func @transform_2(%arg0: i32) -> (i32, i32) {
    %c0_i32 = arith.constant 0 : i32
    %c0_i32_0 = arith.constant 0 : i32
    %c0_i32_1 = arith.constant 0 : i32
    return %c0_i32, %c0_i32_0 : i32, i32
  }
  func.func @transform_3(%arg0: i32) -> (i32, i32) {
    %c0_i32 = arith.constant 0 : i32
    %c0_i32_0 = arith.constant 0 : i32
    %c0_i32_1 = arith.constant 0 : i32
    return %c0_i32, %c0_i32_0 : i32, i32
  }
  func.func @transform_4(%arg0: i32) -> (i32, i32) {
    %c0_i32 = arith.constant 0 : i32
    %c0_i32_0 = arith.constant 0 : i32
    %c0_i32_1 = arith.constant 0 : i32
    return %c0_i32, %c0_i32_0 : i32, i32
  }
  func.func @transform_5(%arg0: i32) -> (i32, i32) {
    %c0_i32 = arith.constant 0 : i32
    %c0_i32_0 = arith.constant 0 : i32
    %c0_i32_1 = arith.constant 0 : i32
    return %c0_i32, %c0_i32_0 : i32, i32
  }
  func.func @transform_6(%arg0: i32) -> (i32, i32) {
    %c0_i32 = arith.constant 0 : i32
    %c0_i32_0 = arith.constant 0 : i32
    %c0_i32_1 = arith.constant 0 : i32
    return %c0_i32, %c0_i32_0 : i32, i32
  }
  func.func @transform_7(%arg0: i32) -> (i32, i32) {
    %c0_i32 = arith.constant 0 : i32
    %c0_i32_0 = arith.constant 0 : i32
    %c0_i32_1 = arith.constant 0 : i32
    return %c0_i32, %c0_i32_0 : i32, i32
  }
  func.func @transform_8(%arg0: i32) -> (i32, i32, i32) {
    %c0_i32 = arith.constant 0 : i32
    %c0_i32_0 = arith.constant 0 : i32
    %c0_i32_1 = arith.constant 0 : i32
    %c0_i32_2 = arith.constant 0 : i32
    return %c0_i32, %c0_i32_0, %c0_i32_1 : i32, i32, i32
  }
  func.func @transform_9(%arg0: i32) -> (i32, i32, i32) {
    %c0_i32 = arith.constant 0 : i32
    %c0_i32_0 = arith.constant 0 : i32
    %c0_i32_1 = arith.constant 0 : i32
    %c0_i32_2 = arith.constant 0 : i32
    return %c0_i32, %c0_i32_0, %c0_i32_1 : i32, i32, i32
  }
  func.func @transform_10(%arg0: i32) -> (i32, i32, i32) {
    %c0_i32 = arith.constant 0 : i32
    %c0_i32_0 = arith.constant 0 : i32
    %c0_i32_1 = arith.constant 0 : i32
    %c0_i32_2 = arith.constant 0 : i32
    return %c0_i32, %c0_i32_0, %c0_i32_1 : i32, i32, i32
  }
  func.func @transform_11(%arg0: i32) -> (i32, i32, i32) {
    %c0_i32 = arith.constant 0 : i32
    %c0_i32_0 = arith.constant 0 : i32
    %c0_i32_1 = arith.constant 0 : i32
    %c0_i32_2 = arith.constant 0 : i32
    return %c0_i32, %c0_i32_0, %c0_i32_1 : i32, i32, i32
  }
  func.func @transform_12(%arg0: i32) -> (i32, i32) {
    %c0_i32 = arith.constant 0 : i32
    %c0_i32_0 = arith.constant 0 : i32
    %c0_i32_1 = arith.constant 0 : i32
    return %c0_i32, %c0_i32_0 : i32, i32
  }
  func.func @transform_13(%arg0: i32) -> (i32, i32) {
    %c0_i32 = arith.constant 0 : i32
    %c0_i32_0 = arith.constant 0 : i32
    %c0_i32_1 = arith.constant 0 : i32
    return %c0_i32, %c0_i32_0 : i32, i32
  }
  func.func @transform_14(%arg0: i32) -> (i32, i32) {
    %c0_i32 = arith.constant 0 : i32
    %c0_i32_0 = arith.constant 0 : i32
    %c0_i32_1 = arith.constant 0 : i32
    return %c0_i32, %c0_i32_0 : i32, i32
  }
  func.func @transform_15(%arg0: i32) -> (i32, i32) {
    %c0_i32 = arith.constant 0 : i32
    %c0_i32_0 = arith.constant 0 : i32
    %c0_i32_1 = arith.constant 0 : i32
    return %c0_i32, %c0_i32_0 : i32, i32
  }
  func.func @transform_16(%arg0: i32) -> (i32, i32) {
    %c0_i32 = arith.constant 0 : i32
    %c0_i32_0 = arith.constant 0 : i32
    %c0_i32_1 = arith.constant 0 : i32
    return %c0_i32, %c0_i32_0 : i32, i32
  }
}

</mosaic_0001>

<bundles_post_ra>
// kernel: receiver_forward.1
= control target key start
LH: loop header
LB: loop body
LE: loop exit
PB: predicated region body
PF: predicated region fallthrough
CT: control target
= control target key end

     0   :  { %s3891_s0 = inlined_call_operand.vmem [shape: f32[16,6], index: 0, kind: input, shape index: {}]   ;;  %s3892_s1 = inlined_call_operand.vmem [shape: f32[16,192], index: 1, kind: input, shape index: {}]   ;;  %s3893_s2 = inlined_call_operand.vmem [shape: f32[16,32], index: 2, kind: input, shape index: {}]   ;;  %s3894_s3 = inlined_call_operand.vmem [shape: f32[2,16], index: 3, kind: input, shape index: {}]   ;;  %s3895_s4 = inlined_call_operand.vmem [shape: f32[2,16], index: 4, kind: input, shape index: {}]   ;;  %s3896_s5 = inlined_call_operand.vmem [shape: f32[64,16], index: 5, kind: input, shape index: {}]   ;;  %s3897_s6 = inlined_call_operand.vmem [shape: f32[64,32], index: 6, kind: input, shape index: {}]   ;;  %s3898_s7 = inlined_call_operand.vmem [shape: f32[192,32], index: 7, kind: input, shape index: {}]   ;;  %s3899_s8 = inlined_call_operand.vmem [shape: f32[2,32,96], index: 8, kind: input, shape index: {}]   ;;  %s3900_s9 = inlined_call_operand.vmem [shape: f32[2,32,32], index: 9, kind: input, shape index: {}]   ;;  %s3901_s10 = inlined_call_operand.vmem [shape: f32[2,32,128], index: 10, kind: input, shape index: {}]   ;;  %s3902_s11 = inlined_call_operand.vmem [shape: f32[2,128,32], index: 11, kind: input, shape index: {}]   ;;  %s3903_s12 = inlined_call_operand.vmem [shape: f32[32,128], index: 12, kind: input, shape index: {}]   ;;  %s3904_s13 = inlined_call_operand.vmem [shape: f32[6,128], index: 13, kind: input, shape index: {}]   ;;  %s3905_s14 = inlined_call_operand.vmem [shape: f32[24,128], index: 14, kind: input, shape index: {}]   ;;  %s3906_s15 = inlined_call_operand.hbm [shape: f32[2,128], index: 15, kind: output, shape index: {0}]   ;;  %s3907_s16 = inlined_call_operand.hbm [shape: f32[2,128], index: 16, kind: output, shape index: {1}]  }
   0x1   :  { %3909 = sst [smem:[#allocation8_spill]] %s3891_s0 }
   0x2   :  { %22 = vsyncpa [#allocation3], 0  ;;  %s3910_s23 = sld [smem:[#allocation8_spill]]  ;;  %v3064_v2 = vmov 0.0|0.0   ;;  %vm3065_vm0 = vmmov 0   ;;  %v3066_v4 = vmov 0.0  }
   0x3   :  { %2708 = vmatprep.subr.bf16.mxu1 %v3064_v2  ;;  %2482 = vmatprep.mubr.msk.f32.mxu1 %vm3065_vm0, %v3066_v4 }
   0x8   :  { %v58_v0 = vld [vmem:[%s3910_s23] sm:$0xff]  ;;  %v59_v1 = vld [vmem:[%s3910_s23 + $0x8] sm:$0xff] }
   0x9   :  { %v2709_v3 = vpack.c.bf16 %v59_v1, %v58_v0 }
   0xa   :  { %23 = vsyncpa [#allocation5], 0  ;;  %v57_v5 = vld [vmem:[%s3894_s3] sm:$0x3]  ;;  %vm60_vm1 = vcmask 130048   ;;  %vm143_vm2 = vcmask 1045504   ;;  %v135_v49 = vlaneseq }
   0xb   :  { %2710 = vmatpush3.bf16.msra.mxu1 %v2709_v3  ;;  %v134_v6 = vld [vmem:[%s3904_s13] sm:$0x3f]  ;;  %v223_v8 = vld [vmem:[%s3898_s7 + $0x8] sm:$0xff]  ;;  %vm139_vm3 = vcmask 48128   ;;  %v224_v10 = vld [vmem:[%s3898_s7 + $0x10] sm:$0xff]  ;;  %vm248_vm4 = vcmask 523264  }
   0xc   :  { %2485 = vmatprep.subr.mxu1 %v3066_v4  ;;  %v222_v7 = vld [vmem:[%s3898_s7] sm:$0xff]  ;;  %v225_v11 = vld [vmem:[%s3898_s7 + $0x18] sm:$0xff]  ;;  %v219_v12 = vld [vmem:[%s3892_s1 + $0x8] sm:$0xff]  ;;  %v3273_v50 = vshrl.u32 %v135_v49, 7  ;;  %vm346_vm5 = vcmask 261120   ;;  %s3067_s17 = smov 96  }
   0xd   :  { %v2712_v9 = vpack.c.bf16 %v223_v8, %v222_v7  ;;  %v2715_v15 = vpack.c.bf16 %v225_v11, %v224_v10  ;;  %v226_v16 = vld [vmem:[%s3898_s7 + $0x20] sm:$0xff]  ;;  %v227_v17 = vld [vmem:[%s3898_s7 + $0x28] sm:$0xff]  ;;  %v228_v19 = vld [vmem:[%s3898_s7 + $0x30] sm:$0xff] }
   0xe   :  { %2483 = vmatmul.mubr.msk.f32.vlgmr.msra.gmra.mrb[0].mxu1 %vm60_vm1, %v57_v5  ;;  %v2718_v18 = vpack.c.bf16 %v227_v17, %v226_v16  ;;  %v229_v20 = vld [vmem:[%s3898_s7 + $0x38] sm:$0xff]  ;;  %v230_v22 = vld [vmem:[%s3898_s7 + $0x40] sm:$0xff]  ;;  %v231_v23 = vld [vmem:[%s3898_s7 + $0x48] sm:$0xff]  ;;  %v3276_v51 = vsub.s32 3, %v3273_v50 }
   0xf   :  { %2486 = vmatpush3.msk.msra.mxu1 %vm143_vm2, %v134_v6  ;;  %2487 = vmatprep.mubr.msk.f32.mxu1 %vm3065_vm0, %v3066_v4  ;;  %v2721_v21 = vpack.c.bf16 %v229_v20, %v228_v19  ;;  %v2724_v24 = vpack.c.bf16 %v231_v23, %v230_v22  ;;  %v232_v25 = vld [vmem:[%s3898_s7 + $0x50] sm:$0xff]  ;;  %v233_v26 = vld [vmem:[%s3898_s7 + $0x58] sm:$0xff]  ;;  %v234_v28 = vld [vmem:[%s3898_s7 + $0x60] sm:$0xff] }
  0x10   :  { %2711 = vmatprep.subr.bf16.mxu1 %v3064_v2  ;;  %v2727_v27 = vpack.c.bf16 %v233_v26, %v232_v25  ;;  %v235_v29 = vld [vmem:[%s3898_s7 + $0x68] sm:$0xff]  ;;  %v236_v31 = vld [vmem:[%s3898_s7 + $0x70] sm:$0xff]  ;;  %v237_v32 = vld [vmem:[%s3898_s7 + $0x78] sm:$0xff] }
  0x11   :  { %v2730_v30 = vpack.c.bf16 %v235_v29, %v234_v28  ;;  %v2733_v33 = vpack.c.bf16 %v237_v32, %v236_v31  ;;  %v238_v34 = vld [vmem:[%s3898_s7 + $0x80] sm:$0xff]  ;;  %v239_v35 = vld [vmem:[%s3898_s7 + $0x88] sm:$0xff]  ;;  %v240_v37 = vld [vmem:[%s3898_s7 + $0x90] sm:$0xff]  ;;  %v3321_v29 = vsub.s32 1, %v3273_v50 }
  0x12   :  { %v2736_v36 = vpack.c.bf16 %v239_v35, %v238_v34  ;;  %v241_v38 = vld [vmem:[%s3898_s7 + $0x98] sm:$0xff]  ;;  %v242_v40 = vld [vmem:[%s3898_s7 + $0xa0] sm:$0xff]  ;;  %v243_v41 = vld [vmem:[%s3898_s7 + $0xa8] sm:$0xff] }
  0x13   :  { %v2739_v39 = vpack.c.bf16 %v241_v38, %v240_v37  ;;  %v2742_v42 = vpack.c.bf16 %v243_v41, %v242_v40  ;;  %v244_v43 = vld [vmem:[%s3898_s7 + $0xb0] sm:$0xff]  ;;  %v245_v44 = vld [vmem:[%s3898_s7 + $0xb8] sm:$0xff]  ;;  %v218_v46 = vld [vmem:[%s3892_s1] sm:$0xff]  ;;  %v3330_v40 = vsub.s32 2, %v3273_v50 }
  0x14   :  { %v2745_v45 = vpack.c.bf16 %v245_v44, %v244_v43  ;;  %v221_v47 = vld [vmem:[%s3892_s1 + $0x18] sm:$0xff]  ;;  %v220_v48 = vld [vmem:[%s3892_s1 + $0x10] sm:$0xff]  ;;  %v246_v57 = vld [vmem:[%s3893_s2] sm:$0xff] }
  0x15   :  { %v56_v52 = vld [vmem:[%s3905_s14 + $0x10] sm:$0xff]  ;;  %v247_v61 = vld [vmem:[%s3893_s2 + $0x8] sm:$0xff]  ;;  %v389_v19 = vld [vmem:[%s3899_s8 + $0x18] sm:$0xff] }
  0x16   :  { %v138_v53 = vrot.slane %v56_v52, %v3276_v51  ;;  %v387_v16 = vld [vmem:[%s3899_s8 + $0x8] sm:$0xff]  ;;  %v388_v17 = vld [vmem:[%s3899_s8 + $0x10] sm:$0xff]  ;;  %v3318_v28 = vld [vmem:[%s3905_s14] sm:$0xff] }
  0x17   :  { %v2751_v20 = vpack.c.bf16 %v389_v19, %v388_v17  ;;  %v393_v41 = vrot.slane %v3318_v28, %v3330_v40  ;;  %vm3347_vm6 = vmpackc.low %vm346_vm5, %vm346_vm5  ;;  %v3420_v17 = vld [vmem:[%s3896_s5 + $0x18] sm:$0xff] }
  0xe1   :  { %v130_v13 = vpop.f32.mrb[0].mxu1 }
  0xe2   :  { %v2484_v14 = vpop.f32.mrb[1].mxu1  ;;  %2488 = vmatmul.mubr.msk.f32.vlgmr.msra.gmra.mrb[2].mxu1 %vm139_vm3, %v130_v13 }
  0xe3   :  { %2713 = vmatpush1.bf16.msra.mxu1 %v2712_v9  ;;  %2273 = vmatprep.mubr.msk.f32.mxu1 %vm248_vm4, %v219_v12 }
  0xe4   :  { %2714 = vmatprep.subr.bf16.mxu1 %v3064_v2 }
  0xe7   :  { %2716 = vmatpush1.bf16.msra.mxu1 %v2715_v15  ;;  %v386_v15 = vld [vmem:[%s3899_s8] sm:$0xff] }
  0xe8   :  { %2717 = vmatprep.subr.bf16.mxu1 %v3064_v2 }
  0xeb   :  { %2719 = vmatpush1.bf16.msra.mxu1 %v2718_v18  ;;  %v2747_v18 = vpack.c.bf16 %v387_v16, %v386_v15 }
  0xec   :  { %2720 = vmatprep.subr.bf16.mxu1 %v3064_v2 }
  0xed   :  { %2748 = vmatprep.subr.bf16.mxu0 %v2747_v18 }
  0xee   :  { %2750 = vmatpush3.bf16.msra.mxu0 %v2747_v18 }
  0xef   :  { %2722 = vmatpush1.bf16.msra.mxu1 %v2721_v21  ;;  %2752 = vmatprep.subr.bf16.mxu0 %v2751_v20 }
  0xf0   :  { %2723 = vmatprep.subr.bf16.mxu1 %v3064_v2 }
  0xf2   :  { %2754 = vmatpush3.bf16.msra.mxu0 %v2751_v20 }
  0xf3   :  { %2725 = vmatpush1.bf16.msra.mxu1 %v2724_v24 }
  0xf4   :  { %2726 = vmatprep.subr.bf16.mxu1 %v3064_v2 }
  0xf7   :  { %2728 = vmatpush1.bf16.msra.mxu1 %v2727_v27  ;;  %v3313_v27 = vsub.s32 0, %v3273_v50 }
  0xf8   :  { %2729 = vmatprep.subr.bf16.mxu1 %v3064_v2 }
  0xfb   :  { %2731 = vmatpush1.bf16.msra.mxu1 %v2730_v30  ;;  %v377_v30 = vrot.slane %v3318_v28, %v3313_v27 }
  0xfc   :  { %2732 = vmatprep.subr.bf16.mxu1 %v3064_v2 }
  0xff   :  { %2734 = vmatpush1.bf16.msra.mxu1 %v2733_v33  ;;  %v383_v33 = vrot.slane %v3318_v28, %v3321_v29 }
 0x100   :  { %2735 = vmatprep.subr.bf16.mxu1 %v3064_v2 }
 0x103   :  { %2737 = vmatpush1.bf16.msra.mxu1 %v2736_v36 }
 0x104   :  { %2738 = vmatprep.subr.bf16.mxu1 %v3064_v2 }
 0x107   :  { %2740 = vmatpush1.bf16.msra.mxu1 %v2739_v39 }
 0x108   :  { %2741 = vmatprep.subr.bf16.mxu1 %v3064_v2 }
 0x10b   :  { %2743 = vmatpush1.bf16.msra.mxu1 %v2742_v42 }
 0x10c   :  { %2744 = vmatprep.subr.bf16.mxu1 %v3064_v2 }
 0x10f   :  { %2746 = vmatpush1.bf16.msra.mxu1 %v2745_v45  ;;  %v3337_v45 = vld [vmem:[%s3897_s6] sm:$0xff] }
 0x112   :  { %320 = vmatmul.mubr.f32.vlgmr.msra.gmra.mrb[4].mxu1 %v218_v46 }
 0x113   :  { %2274 = vmatprep.mubr.msk.f32.mxu1 %vm248_vm4, %v221_v47 }
 0x116   :  { %325 = vmatmul.mubr.f32.gmra.mrb[6].mxu1 %v220_v48 }
 0x1b5   :  { %v213_v54 = vpop.f32.mrb[2].mxu1 }
 0x1b6   :  { %v214_v55 = vadd.f32 %v213_v54, %v138_v53  ;;  %v2489_v56 = vpop.f32.mrb[3].mxu1 }
 0x1b7   :  { %v3358_v56 = vld [vmem:[%s3897_s6 + $0x8] sm:$0xff] }
 0x1b8   :  { %217 = vst [vmem:[#allocation2] sm:$0x3] %v214_v55 }
 0x1e5   :  { %v321_v58 = vpop.f32.mrb[4].mxu1 }
 0x1e6   :  { %v3285_v59 = vadd.f32 %v321_v58, %v246_v57  ;;  %v323_v60 = vpop.f32.mrb[5].mxu1  ;;  %v3363_v57 = vld [vmem:[%s3897_s6 + $0x10] sm:$0xff] }
 0x1e8   :  { %v347_v62 = vsel %vm346_vm5, %v3285_v59, 0.0 }
 0x1e9   :  { %v326_v63 = vpop.f32.mrb[6].mxu1  ;;  %348 = vadd.xlane.f32.xlu0 %v347_v62  ;;  %v3376_v62 = vld [vmem:[%s3897_s6 + $0x20] sm:$0xff] }
 0x1ea   :  { %v3292_v0 = vadd.f32 %v326_v63, %v247_v61  ;;  %v328_v1 = vpop.f32.mrb[7].mxu1  ;;  %v3370_v61 = vld [vmem:[%s3897_s6 + $0x18] sm:$0xff] }
 0x1ec   :  { %v350_v3 = vsel %vm346_vm5, %v3292_v0, 0.0 }
 0x1ed   :  { %351 = vadd.xlane.f32.xlu0 %v350_v3  ;;  %v3384_v3 = vld [vmem:[%s3897_s6 + $0x28] sm:$0xff] }
 0x276   :  { %v349_v5 = vpop.xlane.xlu0 %348 }
 0x277   :  { %v354_v6 = vmul.f32 0.03125, %v349_v5  ;;  %v3390_v5 = vld [vmem:[%s3897_s6 + $0x30] sm:$0xff] }
 0x279   :  { %v356_v7 = vsub.f32 %v3285_v59, %v354_v6 }
 0x27a   :  { %v352_v8 = vpop.xlane.xlu0 %351 }
 0x27b   :  { %v355_v9 = vmul.f32 0.03125, %v352_v8  ;;  %v358_v10 = vmul.f32 %v356_v7, %v356_v7  ;;  %v3398_v8 = vld [vmem:[%s3897_s6 + $0x38] sm:$0xff] }
 0x27d   :  { %v357_v11 = vsub.f32 %v3292_v0, %v355_v9  ;;  %v360_v12 = vsel %vm346_vm5, %v358_v10, 0.0  ;;  %v3407_v10 = vld [vmem:[%s3896_s5 + $0x8] sm:$0xff] }
 0x27e   :  { %361 = vadd.xlane.f32.xlu1 %v360_v12  ;;  %v3412_v12 = vld [vmem:[%s3896_s5] sm:$0xff] }
 0x27f   :  { %v359_v13 = vmul.f32 %v357_v11, %v357_v11 }
 0x281   :  { %v363_v14 = vsel %vm346_vm5, %v359_v13, 0.0 }
 0x282   :  { %364 = vadd.xlane.f32.xlu1 %v363_v14 }
 0x30b   :  { %v362_v21 = vpop.xlane.xlu1 %361 }
 0x30c   :  { %v366_v22 = vmul.f32 0.03125, %v362_v21 }
 0x30e   :  { %v368_v23 = vadd.f32 1e-12, %v366_v22  ;;  %v3427_v22 = vld [vmem:[%s3896_s5 + $0x10] sm:$0xff] }
 0x30f   :  { %v365_v24 = vpop.xlane.xlu1 %364 }
 0x310   :  { %2915 = vrsqrt.f32 %v368_v23  ;;  %v367_v25 = vmul.f32 0.03125, %v365_v24 }
 0x312   :  { %v369_v26 = vadd.f32 1e-12, %v367_v25 }
 0x314   :  { %2917 = vrsqrt.f32 %v369_v26 }
 0x31a   :  { %v2916_v31 = vpop.eup %2915 }
 0x31b   :  { %v372_v32 = vmul.f32 %v2916_v31, %v356_v7  ;;  %v3439_v31 = vld [vmem:[%s3896_s5 + $0x20] sm:$0xff] }
 0x31d   :  { %v378_v34 = vmul.f32 %v377_v30, %v372_v32 }
 0x31e   :  { %v2918_v35 = vpop.eup %2917 }
 0x31f   :  { %v373_v36 = vmul.f32 %v2918_v35, %v357_v11  ;;  %v384_v37 = vadd.f32 %v383_v33, %v378_v34 }
 0x321   :  { %v379_v38 = vmul.f32 %v377_v30, %v373_v36  ;;  %2498 = vmatprep.mubr.msk.f32.mxu0 %vm346_vm5, %v384_v37  ;;  %v3434_v30 = vld [vmem:[%s3896_s5 + $0x30] sm:$0xff]  ;;  %v3447_v37 = vld [vmem:[%s3896_s5 + $0x28] sm:$0xff] }
 0x323   :  { %v385_v39 = vadd.f32 %v383_v33, %v379_v38 }
 0x325   :  { %2499 = vmatmul.mubr.msk.f32.vlgmr.msra.gmra.mrb[0].mxu0 %vm346_vm5, %v385_v39 }
 0x3f8   :  { %v2500_v42 = vpop.f32.mrb[0].mxu0 }
 0x3f9   :  { %v472_v43 = vadd.f32 %v2500_v42, %v393_v41  ;;  %v466_v44 = vpop.f32.mrb[1].mxu0  ;;  %v3455_v42 = vld [vmem:[%s3896_s5 + $0x38] sm:$0xff]  ;;  %s3068_s5 = smov 64  }
 0x3fa   :  { %v467_v46 = vadd.f32 %v466_v44, %v393_v41 }
 0x3fb   :  { %v476_v58 = vmul.f32 %v472_v43, %v3358_v56  ;;  %v478_v63 = vmul.f32 %v472_v43, %v3370_v61  ;;  %v480_v6 = vmul.f32 %v472_v43, %v3384_v3  ;;  %v482_v9 = vmul.f32 %v472_v43, %v3398_v8 }
 0x3fc   :  { %v3339_v47 = vpack.i.bf16 %v472_v43, %v467_v46  ;;  %v475_v48 = vmul.f32 %v467_v46, %v3337_v45  ;;  %v477_v60 = vmul.f32 %v467_v46, %v3363_v57  ;;  %v479_v1 = vmul.f32 %v467_v46, %v3376_v62 }
 0x3fd   :  { %v481_v7 = vmul.f32 %v467_v46, %v3390_v5 }
 0x3fe   :  { %2896 = vrot.lane.b32.xlu0 %v3339_v47, %s3067_s17  ;;  %2505 = vmatprep.mubr.msk.f32.mxu0 %vm346_vm5, %v475_v48 }
 0x470   :  { %v2897_v49 = vpop.permute.xlu0 %2896 }
 0x471   :  { %v2899_v52 = vunpack.i.h.bf16 %v2897_v49  ;;  %v2898_v53 = vunpack.i.l.bf16 %v2897_v49 }
 0x473   :  { %v2755_v55 = vpack.c.bf16 %v2899_v52, %v2898_v53 }
 0x475   :  { %2757 = vmatprep.subr.msk.bf16.mxu0 %vm3347_vm6, %v2755_v55 }
 0x476   :  { %2760 = vmatpush3.bf16.xpose.msk.msra.mxu0 %vm3347_vm6, %v2755_v55 }
 0x47d   :  { %2506 = vmatmul.mubr.msk.f32.vlgmr.msra.gmra.mrb[2].mxu0 %vm346_vm5, %v476_v58 }
 0x47e   :  { %2508 = vmatprep.mubr.msk.f32.mxu0 %vm346_vm5, %v477_v60 }
 0x481   :  { %2509 = vmatmul.mubr.msk.f32.gmra.mrb[4].mxu0 %vm346_vm5, %v478_v63 }
 0x482   :  { %2511 = vmatprep.mubr.msk.f32.mxu0 %vm346_vm5, %v479_v1 }
 0x485   :  { %2512 = vmatmul.mubr.msk.f32.gmra.mrb[6].mxu0 %vm346_vm5, %v480_v6 }
 0x486   :  { %2514 = vmatprep.mubr.msk.f32.mxu0 %vm346_vm5, %v481_v7 }
 0x489   :  { %2515 = vmatmul.mubr.msk.f32.gmra.mrb[8].mxu0 %vm346_vm5, %v482_v9 }
 0x550   :  { %v2507_v11 = vpop.f32.mrb[2].mxu0 }
 0x551   :  { %v589_v13 = vadd.f32 %v2507_v11, %v3407_v10  ;;  %v583_v14 = vpop.f32.mrb[3].mxu0 }
 0x552   :  { %v584_v15 = vadd.f32 %v583_v14, %v3412_v12 }
 0x553   :  { %v625_v16 = vsel %vm60_vm1, %v589_v13, -inf }
 0x554   :  { %626 = vmax.xlane.f32.xlu1 %v625_v16  ;;  %v2510_v18 = vpop.f32.mrb[4].mxu0  ;;  %v622_v21 = vsel %vm60_vm1, %v584_v15, -inf }
 0x555   :  { %v593_v19 = vpop.f32.mrb[5].mxu0  ;;  %v599_v20 = vadd.f32 %v2510_v18, %v3420_v17 }
 0x556   :  { %v594_v25 = vadd.f32 %v593_v19, %v3427_v22 }
 0x557   :  { %v631_v26 = vsel %vm60_vm1, %v599_v20, -inf }
 0x558   :  { %v2513_v23 = vpop.f32.mrb[6].mxu0  ;;  %623 = vmax.xlane.f32.xlu1 %v622_v21  ;;  %v628_v36 = vsel %vm60_vm1, %v594_v25, -inf }
 0x559   :  { %v603_v24 = vpop.f32.mrb[7].mxu0  ;;  %v609_v39 = vadd.f32 %v2513_v23, %v3447_v37 }
 0x55a   :  { %v604_v35 = vadd.f32 %v603_v24, %v3439_v31 }
 0x55b   :  { %v637_v44 = vsel %vm60_vm1, %v609_v39, -inf }
 0x55c   :  { %v2516_v32 = vpop.f32.mrb[8].mxu0  ;;  %632 = vmax.xlane.f32.xlu1 %v631_v26  ;;  %v634_v41 = vsel %vm60_vm1, %v604_v35, -inf }
 0x55d   :  { %v613_v33 = vpop.f32.mrb[9].mxu0  ;;  %v619_v43 = vadd.f32 %v2516_v32, %v3455_v42 }
 0x55e   :  { %v614_v34 = vadd.f32 %v613_v33, %v3434_v30 }
 0x55f   :  { %v643_v46 = vsel %vm60_vm1, %v619_v43, -inf }
 0x560   :  { %629 = vmax.xlane.f32.xlu1 %v628_v36  ;;  %v640_v38 = vsel %vm60_vm1, %v614_v34, -inf }
 0x561   :  { %641 = vmax.xlane.f32.xlu0 %v640_v38 }
 0x564   :  { %635 = vmax.xlane.f32.xlu1 %v634_v41 }
 0x568   :  { %638 = vmax.xlane.f32.xlu1 %v637_v44 }
 0x56c   :  { %644 = vmax.xlane.f32.xlu1 %v643_v46 }
 0x5e1   :  { %v627_v48 = vpop.xlane.xlu1 %626 }
 0x5e2   :  { %v647_v49 = vsub.f32 %v589_v13, %v627_v48 }
 0x5e4   :  { %v656_v52 = vmul.f32 1.442695, %v647_v49 }
 0x5e5   :  { %v624_v53 = vpop.xlane.xlu1 %623 }
 0x5e6   :  { %2919 = vpow2.f32 %v656_v52  ;;  %v646_v55 = vsub.f32 %v584_v15, %v624_v53 }
 0x5e8   :  { %v654_v58 = vmul.f32 1.442695, %v646_v55 }
 0x5e9   :  { %v633_v60 = vpop.xlane.xlu1 %632 }
 0x5ea   :  { %2921 = vpow2.f32 %v654_v58  ;;  %v649_v63 = vsub.f32 %v599_v20, %v633_v60 }
 0x5ec   :  { %v660_v1 = vmul.f32 1.442695, %v649_v63 }
 0x5ed   :  { %v630_v6 = vpop.xlane.xlu1 %629 }
 0x5ee   :  { %2923 = vpow2.f32 %v660_v1  ;;  %v648_v7 = vsub.f32 %v594_v25, %v630_v6  ;;  %v642_v15 = vpop.xlane.xlu0 %641 }
 0x5ef   :  { %v652_v24 = vsub.f32 %v614_v34, %v642_v15 }
 0x5f0   :  { %v3460_v9 = vpop.eup %2919  ;;  %v658_v11 = vmul.f32 1.442695, %v648_v7 }
 0x5f1   :  { %v636_v14 = vpop.xlane.xlu1 %635  ;;  %v673_v16 = vsel %vm60_vm1, %v3460_v9, 0.0 }
 0x5f2   :  { %2925 = vpow2.f32 %v658_v11  ;;  %674 = vadd.xlane.f32.xlu1 %v673_v16  ;;  %v650_v18 = vsub.f32 %v604_v35, %v636_v14  ;;  %v666_v35 = vmul.f32 1.442695, %v652_v24 }
 0x5f4   :  { %v2922_v13 = vpop.eup %2921  ;;  %v662_v25 = vmul.f32 1.442695, %v650_v18 }
 0x5f5   :  { %v639_v19 = vpop.xlane.xlu1 %638  ;;  %v670_v21 = vsel %vm60_vm1, %v2922_v13, 0.0 }
 0x5f6   :  { %v651_v20 = vsub.f32 %v609_v39, %v639_v19  ;;  %671 = vadd.xlane.f32.xlu1 %v670_v21 }
 0x5f8   :  { %v3465_v23 = vpop.eup %2923  ;;  %v664_v26 = vmul.f32 1.442695, %v651_v20 }
 0x5f9   :  { %v645_v32 = vpop.xlane.xlu1 %644  ;;  %v679_v33 = vsel %vm60_vm1, %v3465_v23, 0.0 }
 0x5fa   :  { %2927 = vpow2.f32 %v664_v26  ;;  %v653_v36 = vsub.f32 %v619_v43, %v645_v32  ;;  %680 = vadd.xlane.f32.xlu1 %v679_v33 }
 0x5fb   :  { %2929 = vpow2.f32 %v662_v25 }
 0x5fc   :  { %v2926_v38 = vpop.eup %2925  ;;  %v668_v41 = vmul.f32 1.442695, %v653_v36 }
 0x5fd   :  { %v676_v44 = vsel %vm60_vm1, %v2926_v38, 0.0 }
 0x5fe   :  { %2931 = vpow2.f32 %v668_v41  ;;  %677 = vadd.xlane.f32.xlu1 %v676_v44 }
 0x5ff   :  { %2933 = vpow2.f32 %v666_v35 }
 0x604   :  { %v2928_v39 = vpop.eup %2927 }
 0x605   :  { %v685_v34 = vsel %vm60_vm1, %v2928_v39, 0.0  ;;  %v2930_v46 = vpop.eup %2929 }
 0x606   :  { %686 = vadd.xlane.f32.xlu1 %v685_v34  ;;  %v682_v49 = vsel %vm60_vm1, %v2930_v46, 0.0 }
 0x608   :  { %v2932_v48 = vpop.eup %2931 }
 0x609   :  { %v691_v43 = vsel %vm60_vm1, %v2932_v48, 0.0  ;;  %v2934_v52 = vpop.eup %2933 }
 0x60a   :  { %683 = vadd.xlane.f32.xlu1 %v682_v49  ;;  %692 = vadd.xlane.f32.xlu0 %v691_v43  ;;  %v688_v53 = vsel %vm60_vm1, %v2934_v52, 0.0 }
 0x60e   :  { %689 = vadd.xlane.f32.xlu1 %v688_v53 }
 0x61f   :  { %2901 = vrot.lane.b32.xlu1 %v3339_v47, %s3068_s5 }
 0x67f   :  { %v675_v55 = vpop.xlane.xlu1 %674 }
 0x683   :  { %v672_v58 = vpop.xlane.xlu1 %671 }
 0x684   :  { %2935 = vrcp.f32 %v672_v58 }
 0x685   :  { %2937 = vrcp.f32 %v675_v55 }
 0x687   :  { %v681_v60 = vpop.xlane.xlu1 %680 }
 0x68b   :  { %v678_v1 = vpop.xlane.xlu1 %677 }
 0x68c   :  { %2939 = vrcp.f32 %v678_v1 }
 0x68d   :  { %2941 = vrcp.f32 %v681_v60 }
 0x68e   :  { %v2936_v63 = vpop.eup %2935 }
 0x68f   :  { %v702_v6 = vmul.f32 %v2936_v63, %v2922_v13  ;;  %v2938_v21 = vpop.eup %2937 }
 0x690   :  { %v703_v13 = vmul.f32 %v2938_v21, %v3460_v9 }
 0x691   :  { %2521 = vmatprep.mubr.msk.f32.mxu0 %vm60_vm1, %v702_v6 }
 0x693   :  { %v687_v7 = vpop.xlane.xlu1 %686 }
 0x696   :  { %v2940_v20 = vpop.eup %2939 }
 0x697   :  { %v684_v11 = vpop.xlane.xlu1 %683  ;;  %v693_v47 = vpop.xlane.xlu0 %692  ;;  %v704_v25 = vmul.f32 %v2940_v20, %v2926_v38  ;;  %v860_v38 = vld [vmem:[%s3900_s9 + $0x8] sm:$0xff] }
 0x698   :  { %2943 = vrcp.f32 %v684_v11  ;;  %v2942_v24 = vpop.eup %2941 }
 0x699   :  { %2945 = vrcp.f32 %v687_v7  ;;  %v705_v32 = vmul.f32 %v2942_v24, %v3465_v23  ;;  %v859_v23 = vld [vmem:[%s3900_s9] sm:$0xff] }
 0x69b   :  { %v690_v14 = vpop.xlane.xlu1 %689 }
 0x69c   :  { %2947 = vrcp.f32 %v690_v14 }
 0x69d   :  { %2949 = vrcp.f32 %v693_v47 }
 0x69f   :  { %v2902_v16 = vpop.permute.xlu1 %2901 }
 0x6a0   :  { %v2904_v18 = vunpack.i.h.bf16 %v2902_v16  ;;  %v2903_v15 = vunpack.i.l.bf16 %v2902_v16 }
 0x6a2   :  { %v2761_v19 = vpack.c.bf16 %v2904_v18, %v2903_v15  ;;  %v2944_v26 = vpop.eup %2943 }
 0x6a3   :  { %v2946_v33 = vpop.eup %2945  ;;  %v706_v36 = vmul.f32 %v2944_v26, %v2930_v46  ;;  %v2765_v46 = vpack.c.bf16 %v860_v38, %v859_v23 }
 0x6a4   :  { %2762 = vmatprep.subr.bf16.mxu0 %v2761_v19  ;;  %v707_v41 = vmul.f32 %v2946_v33, %v2928_v39  ;;  %v861_v39 = vld [vmem:[%s3900_s9 + $0x10] sm:$0xff] }
 0x6a5   :  { %2764 = vmatpush3.bf16.msra.mxu0 %v2761_v19 }
 0x6a6   :  { %v2948_v35 = vpop.eup %2947  ;;  %2766 = vmatprep.subr.bf16.mxu0 %v2765_v46 }
 0x6a7   :  { %v2950_v44 = vpop.eup %2949  ;;  %v708_v34 = vmul.f32 %v2948_v35, %v2934_v52 }
 0x6a8   :  { %2522 = vmatmul.mubr.msk.f32.vlgmr.msra.gmra.mrb[10].mxu0 %vm60_vm1, %v703_v13  ;;  %v709_v9 = vmul.f32 %v2950_v44, %v2932_v48  ;;  %v862_v48 = vld [vmem:[%s3900_s9 + $0x18] sm:$0xff] }
 0x6a9   :  { %2524 = vmatprep.mubr.msk.f32.mxu0 %vm60_vm1, %v704_v25  ;;  %2768 = vmatpush3.bf16.msra.mxu0 %v2765_v46  ;;  %v2769_v49 = vpack.c.bf16 %v862_v48, %v861_v39 }
 0x6ab   :  { %2770 = vmatprep.subr.bf16.mxu0 %v2769_v49 }
 0x6ac   :  { %2525 = vmatmul.mubr.msk.f32.gmra.mrb[12].mxu0 %vm60_vm1, %v705_v32  ;;  %v949_v32 = vrot.slane %v3318_v28, %v3276_v51 }
 0x6ad   :  { %2527 = vmatprep.mubr.msk.f32.mxu0 %vm60_vm1, %v706_v36  ;;  %2772 = vmatpush3.bf16.msra.mxu0 %v2769_v49 }
 0x6b0   :  { %2528 = vmatmul.mubr.msk.f32.gmra.mrb[14].mxu0 %vm60_vm1, %v707_v41 }
 0x6b1   :  { %2530 = vmatprep.mubr.msk.f32.mxu0 %vm60_vm1, %v708_v34 }
 0x6b4   :  { %2531 = vmatmul.mubr.msk.f32.gmra.mrb[16].mxu0 %vm60_vm1, %v709_v9 }
 0x77b   :  { %v2523_v43 = vpop.f32.mrb[10].mxu0 }
 0x77c   :  { %v806_v52 = vpop.f32.mrb[11].mxu0  ;;  %v846_v55 = vmul.f32 %v2523_v43, %v3358_v56 }
 0x77d   :  { %v845_v63 = vmul.f32 %v806_v52, %v3337_v45 }
 0x77f   :  { %v2526_v53 = vpop.f32.mrb[12].mxu0 }
 0x780   :  { %v848_v58 = vmul.f32 %v2526_v53, %v3370_v61  ;;  %v816_v60 = vpop.f32.mrb[13].mxu0  ;;  %v990_v53 = vld [vmem:[%s3901_s10] sm:$0xff] }
 0x781   :  { %v847_v1 = vmul.f32 %v816_v60, %v3363_v57  ;;  %v992_v60 = vld [vmem:[%s3901_s10 + $0x10] sm:$0xff] }
 0x782   :  { %v854_v6 = vadd.f32 %v848_v58, %v846_v55  ;;  %v991_v55 = vld [vmem:[%s3901_s10 + $0x8] sm:$0xff] }
 0x783   :  { %v853_v7 = vadd.f32 %v847_v1, %v845_v63  ;;  %v2529_v11 = vpop.f32.mrb[14].mxu0  ;;  %v2773_v58 = vpack.c.bf16 %v991_v55, %v990_v53  ;;  %v993_v63 = vld [vmem:[%s3901_s10 + $0x18] sm:$0xff]  ;;  %v1106_v53 = vld [vmem:[%s3902_s11 + $0x48] sm:$0xff]  ;;  %v1107_v55 = vld [vmem:[%s3902_s11 + $0x50] sm:$0xff] }
 0x784   :  { %v850_v14 = vmul.f32 %v2529_v11, %v3384_v3  ;;  %v826_v16 = vpop.f32.mrb[15].mxu0  ;;  %v2777_v1 = vpack.c.bf16 %v993_v63, %v992_v60  ;;  %v1108_v60 = vld [vmem:[%s3902_s11 + $0x58] sm:$0xff] }
 0x785   :  { %v849_v18 = vmul.f32 %v826_v16, %v3376_v62  ;;  %2774 = vmatprep.subr.bf16.mxu1 %v2773_v58  ;;  %v2801_v63 = vpack.c.bf16 %v1108_v60, %v1107_v55 }
 0x786   :  { %v856_v15 = vadd.f32 %v854_v6, %v850_v14  ;;  %2776 = vmatpush3.bf16.msra.mxu1 %v2773_v58 }
 0x787   :  { %v855_v47 = vadd.f32 %v853_v7, %v849_v18  ;;  %v2532_v19 = vpop.f32.mrb[16].mxu0  ;;  %2778 = vmatprep.subr.bf16.mxu1 %v2777_v1 }
 0x788   :  { %v852_v21 = vmul.f32 %v2532_v19, %v3398_v8  ;;  %v836_v20 = vpop.f32.mrb[17].mxu0 }
 0x789   :  { %v851_v13 = vmul.f32 %v836_v20, %v3390_v5 }
 0x78a   :  { %v858_v24 = vadd.f32 %v856_v15, %v852_v21  ;;  %2780 = vmatpush3.bf16.msra.mxu1 %v2777_v1  ;;  %v980_v15 = vsub.s32 4, %v3273_v50  ;;  %v1109_v1 = vld [vmem:[%s3902_s11 + $0x60] sm:$0xff] }
 0x78b   :  { %v857_v25 = vadd.f32 %v855_v47, %v851_v13  ;;  %v986_v47 = vsub.s32 5, %v3273_v50 }
 0x78c   :  { %v981_v19 = vrot.slane %v3318_v28, %v980_v15 }
 0x78d   :  { %2541 = vmatprep.mubr.msk.f32.mxu0 %vm346_vm5, %v857_v25  ;;  %v987_v13 = vrot.slane %v3318_v28, %v986_v47 }
 0x78e   :  { %2542 = vmatmul.mubr.msk.f32.vlgmr.msra.gmra.mrb[18].mxu0 %vm346_vm5, %v858_v24 }
 0x861   :  { %v2543_v26 = vpop.f32.mrb[18].mxu0 }
 0x862   :  { %v935_v33 = vpop.f32.mrb[19].mxu0  ;;  %v945_v36 = vadd.f32 %v2543_v26, %v3292_v0 }
 0x863   :  { %v944_v35 = vadd.f32 %v935_v33, %v3285_v59 }
 0x864   :  { %v3514_v44 = vadd.f32 %v949_v32, %v945_v36 }
 0x865   :  { %v3512_v41 = vadd.f32 %v949_v32, %v944_v35  ;;  %v1097_v35 = vld [vmem:[%s3902_s11] sm:$0xff] }
 0x866   :  { %v955_v9 = vsel %vm346_vm5, %v3514_v44, 0.0 }
 0x867   :  { %v952_v34 = vsel %vm346_vm5, %v3512_v41, 0.0 }
 0x868   :  { %953 = vadd.xlane.f32.xlu0 %v952_v34  ;;  %v1098_v34 = vld [vmem:[%s3902_s11 + $0x8] sm:$0xff] }
 0x86c   :  { %956 = vadd.xlane.f32.xlu0 %v955_v9  ;;  %v2781_v9 = vpack.c.bf16 %v1098_v34, %v1097_v35 }
 0x86e   :  { %2782 = vmatprep.subr.bf16.mxu0 %v2781_v9 }
 0x86f   :  { %2784 = vmatpush3.bf16.msra.mxu0 %v2781_v9 }
 0x8f5   :  { %v954_v23 = vpop.xlane.xlu0 %953 }
 0x8f6   :  { %v958_v38 = vmul.f32 0.03125, %v954_v23  ;;  %v1099_v23 = vld [vmem:[%s3902_s11 + $0x10] sm:$0xff] }
 0x8f8   :  { %v960_v46 = vsub.f32 %v3512_v41, %v958_v38  ;;  %v1100_v38 = vld [vmem:[%s3902_s11 + $0x18] sm:$0xff] }
 0x8f9   :  { %v957_v39 = vpop.xlane.xlu0 %956 }
 0x8fa   :  { %v959_v0 = vmul.f32 0.03125, %v957_v39  ;;  %v962_v48 = vmul.f32 %v960_v46, %v960_v46  ;;  %v1101_v39 = vld [vmem:[%s3902_s11 + $0x20] sm:$0xff] }
 0x8fc   :  { %v961_v59 = vsub.f32 %v3514_v44, %v959_v0  ;;  %v964_v49 = vsel %vm346_vm5, %v962_v48, 0.0  ;;  %v1102_v0 = vld [vmem:[%s3902_s11 + $0x28] sm:$0xff] }
 0x8fd   :  { %965 = vadd.xlane.f32.xlu0 %v964_v49  ;;  %v2789_v48 = vpack.c.bf16 %v1102_v0, %v1101_v39  ;;  %v1104_v49 = vld [vmem:[%s3902_s11 + $0x38] sm:$0xff] }
 0x8fe   :  { %v963_v43 = vmul.f32 %v961_v59, %v961_v59 }
 0x900   :  { %v967_v52 = vsel %vm346_vm5, %v963_v43, 0.0 }
 0x901   :  { %968 = vadd.xlane.f32.xlu0 %v967_v52  ;;  %v1105_v52 = vld [vmem:[%s3902_s11 + $0x40] sm:$0xff] }
 0x902   :  { %v2797_v58 = vpack.c.bf16 %v1106_v53, %v1105_v52  ;;  %v1192_v53 = vsub.s32 7, %v3273_v50 }
 0x904   :  { %v1193_v55 = vrot.slane %v3318_v28, %v1192_v53 }
 0x98a   :  { %v966_v6 = vpop.xlane.xlu0 %965 }
 0x98b   :  { %v970_v7 = vmul.f32 0.03125, %v966_v6  ;;  %v1110_v6 = vld [vmem:[%s3902_s11 + $0x68] sm:$0xff] }
 0x98d   :  { %v972_v11 = vadd.f32 1e-12, %v970_v7  ;;  %v2805_v7 = vpack.c.bf16 %v1110_v6, %v1109_v1 }
 0x98e   :  { %v969_v14 = vpop.xlane.xlu0 %968 }
 0x98f   :  { %2951 = vrsqrt.f32 %v972_v11  ;;  %v971_v16 = vmul.f32 0.03125, %v969_v14  ;;  %v1111_v11 = vld [vmem:[%s3902_s11 + $0x70] sm:$0xff]  ;;  %v1112_v14 = vld [vmem:[%s3902_s11 + $0x78] sm:$0xff] }
 0x991   :  { %v973_v18 = vadd.f32 1e-12, %v971_v16  ;;  %v2809_v16 = vpack.c.bf16 %v1112_v14, %v1111_v11 }
 0x993   :  { %2953 = vrsqrt.f32 %v973_v18  ;;  %v996_v18 = vsub.s32 6, %v3273_v50 }
 0x999   :  { %v2952_v21 = vpop.eup %2951 }
 0x99a   :  { %v976_v20 = vmul.f32 %v2952_v21, %v960_v46  ;;  %v2785_v46 = vpack.c.bf16 %v1100_v38, %v1099_v23 }
 0x99c   :  { %v982_v24 = vmul.f32 %v981_v19, %v976_v20  ;;  %2786 = vmatprep.subr.bf16.mxu0 %v2785_v46 }
 0x99d   :  { %v2954_v25 = vpop.eup %2953  ;;  %2788 = vmatpush3.bf16.msra.mxu0 %v2785_v46 }
 0x99e   :  { %v977_v26 = vmul.f32 %v2954_v25, %v961_v59  ;;  %v988_v32 = vadd.f32 %v987_v13, %v982_v24  ;;  %2790 = vmatprep.subr.bf16.mxu0 %v2789_v48  ;;  %v1103_v59 = vld [vmem:[%s3902_s11 + $0x30] sm:$0xff] }
 0x99f   :  { %v2793_v43 = vpack.c.bf16 %v1104_v49, %v1103_v59 }
 0x9a0   :  { %v983_v33 = vmul.f32 %v981_v19, %v977_v26  ;;  %2552 = vmatprep.mubr.msk.f32.mxu1 %vm346_vm5, %v988_v32  ;;  %v997_v19 = vrot.slane %v3318_v28, %v996_v18 }
 0x9a1   :  { %2792 = vmatpush3.bf16.msra.mxu0 %v2789_v48 }
 0x9a2   :  { %v989_v36 = vadd.f32 %v987_v13, %v983_v33  ;;  %2794 = vmatprep.subr.bf16.mxu0 %v2793_v43 }
 0x9a4   :  { %2553 = vmatmul.mubr.msk.f32.vlgmr.msra.gmra.mrb[8].mxu1 %vm346_vm5, %v989_v36 }
 0x9a5   :  { %2796 = vmatpush3.bf16.msra.mxu0 %v2793_v43 }
 0x9a6   :  { %2798 = vmatprep.subr.bf16.mxu0 %v2797_v58 }
 0x9a9   :  { %2800 = vmatpush3.bf16.msra.mxu0 %v2797_v58 }
 0x9aa   :  { %2802 = vmatprep.subr.bf16.mxu0 %v2801_v63 }
 0x9ad   :  { %2804 = vmatpush3.bf16.msra.mxu0 %v2801_v63 }
 0x9ae   :  { %2806 = vmatprep.subr.bf16.mxu0 %v2805_v7 }
 0x9b1   :  { %2808 = vmatpush3.bf16.msra.mxu0 %v2805_v7 }
 0x9b2   :  { %2810 = vmatprep.subr.bf16.mxu0 %v2809_v16 }
 0x9b5   :  { %2812 = vmatpush3.bf16.msra.mxu0 %v2809_v16 }
 0xa77   :  { %v2554_v21 = vpop.f32.mrb[8].mxu1 }
 0xa78   :  { %v1076_v20 = vadd.f32 %v2554_v21, %v997_v19  ;;  %v1070_v13 = vpop.f32.mrb[9].mxu1 }
 0xa79   :  { %v1071_v24 = vadd.f32 %v1070_v13, %v997_v19 }
 0xa7a   :  { %v1080_v25 = vmul.f32 %v1076_v20, %v1076_v20 }
 0xa7b   :  { %v1079_v26 = vmul.f32 %v1071_v24, %v1071_v24 }
 0xa7c   :  { %v1082_v32 = vmul.f32 %v1080_v25, %v1076_v20 }
 0xa7d   :  { %v1081_v33 = vmul.f32 %v1079_v26, %v1071_v24  ;;  %v2299_v26 = vld [vmem:[%s3899_s8 + $0x20] sm:$0xff] }
 0xa7e   :  { %v1084_v36 = vmul.f32 0.044715, %v1082_v32  ;;  %v2300_v32 = vld [vmem:[%s3899_s8 + $0x28] sm:$0xff] }
 0xa7f   :  { %v1083_v35 = vmul.f32 0.044715, %v1081_v33  ;;  %v2813_v33 = vpack.c.bf16 %v2300_v32, %v2299_v26 }
 0xa80   :  { %v1086_v34 = vadd.f32 %v1084_v36, %v1076_v20  ;;  %v2301_v36 = vld [vmem:[%s3899_s8 + $0x30] sm:$0xff] }
 0xa81   :  { %v1085_v9 = vadd.f32 %v1083_v35, %v1071_v24  ;;  %2814 = vmatprep.subr.bf16.mxu1 %v2813_v33  ;;  %v2302_v35 = vld [vmem:[%s3899_s8 + $0x38] sm:$0xff] }
 0xa82   :  { %v1088_v23 = vmul.f32 0.7978846, %v1086_v34  ;;  %2816 = vmatpush3.bf16.msra.mxu1 %v2813_v33  ;;  %v2817_v34 = vpack.c.bf16 %v2302_v35, %v2301_v36 }
 0xa83   :  { %v1087_v38 = vmul.f32 0.7978846, %v1085_v9 }
 0xa84   :  { %2955 = vtanh.f32 %v1088_v23  ;;  %2818 = vmatprep.subr.bf16.mxu1 %v2817_v34 }
 0xa85   :  { %2957 = vtanh.f32 %v1087_v38 }
 0xa86   :  { %2820 = vmatpush3.bf16.msra.mxu1 %v2817_v34 }
 0xa8e   :  { %v2956_v46 = vpop.eup %2955 }
 0xa8f   :  { %v2958_v39 = vpop.eup %2957  ;;  %v1092_v0 = vadd.f32 1.0, %v2956_v46 }
 0xa90   :  { %v1091_v48 = vadd.f32 1.0, %v2958_v39 }
 0xa91   :  { %v1094_v59 = vmul.f32 0.5, %v1092_v0 }
 0xa92   :  { %v1093_v49 = vmul.f32 0.5, %v1091_v48  ;;  %v3631_v48 = vld [vmem:[%s3905_s14 + $0x8] sm:$0xff] }
 0xa93   :  { %v1096_v52 = vmul.f32 %v1094_v59, %v1076_v20  ;;  %v1225_v59 = vrot.slane %v3631_v48, %v3313_v27 }
 0xa94   :  { %v1095_v43 = vmul.f32 %v1093_v49, %v1071_v24 }
 0xa96   :  { %2587 = vmatprep.mubr.f32.mxu0 %v1095_v43 }
 0xa97   :  { %2588 = vmatmul.mubr.f32.vlgmr.msra.gmra.mrb[20].mxu0 %v1096_v52  ;;  %v1231_v52 = vrot.slane %v3631_v48, %v3321_v29 }
 0xb6a   :  { %v2589_v58 = vpop.f32.mrb[20].mxu0 }
 0xb6b   :  { %v1189_v60 = vadd.f32 %v2589_v58, %v3514_v44  ;;  %v1179_v63 = vpop.f32.mrb[21].mxu0 }
 0xb6c   :  { %v1188_v1 = vadd.f32 %v1179_v63, %v3512_v41 }
 0xb6d   :  { %v3604_v6 = vadd.f32 %v1193_v55, %v1189_v60 }
 0xb6e   :  { %v3606_v7 = vadd.f32 %v1193_v55, %v1188_v1 }
 0xb6f   :  { %v1199_v11 = vsel %vm346_vm5, %v3604_v6, 0.0 }
 0xb70   :  { %1200 = vadd.xlane.f32.xlu1 %v1199_v11  ;;  %v1196_v14 = vsel %vm346_vm5, %v3606_v7, 0.0 }
 0xb71   :  { %1197 = vadd.xlane.f32.xlu0 %v1196_v14  ;;  %v1242_v14 = vrot.slane %v3631_v48, %v3330_v40 }
 0xbfd   :  { %v1201_v16 = vpop.xlane.xlu1 %1200 }
 0xbfe   :  { %v1203_v28 = vmul.f32 0.03125, %v1201_v16  ;;  %v1198_v19 = vpop.xlane.xlu0 %1197 }
 0xbff   :  { %v1202_v21 = vmul.f32 0.03125, %v1198_v19 }
 0xc00   :  { %v1205_v44 = vsub.f32 %v3604_v6, %v1203_v28 }
 0xc01   :  { %v1204_v41 = vsub.f32 %v3606_v7, %v1202_v21 }
 0xc02   :  { %v1207_v24 = vmul.f32 %v1205_v44, %v1205_v44 }
 0xc03   :  { %v1206_v20 = vmul.f32 %v1204_v41, %v1204_v41 }
 0xc04   :  { %v1211_v25 = vsel %vm346_vm5, %v1207_v24, 0.0 }
 0xc05   :  { %v1208_v13 = vsel %vm346_vm5, %v1206_v20, 0.0 }
 0xc06   :  { %1209 = vadd.xlane.f32.xlu0 %v1208_v13 }
 0xc0a   :  { %1212 = vadd.xlane.f32.xlu0 %v1211_v25 }
 0xc93   :  { %v1210_v9 = vpop.xlane.xlu0 %1209 }
 0xc94   :  { %v1214_v23 = vmul.f32 0.03125, %v1210_v9 }
 0xc96   :  { %v1216_v38 = vadd.f32 1e-12, %v1214_v23 }
 0xc97   :  { %v1213_v46 = vpop.xlane.xlu0 %1212 }
 0xc98   :  { %2959 = vrsqrt.f32 %v1216_v38  ;;  %v1215_v39 = vmul.f32 0.03125, %v1213_v46 }
 0xc9a   :  { %v1217_v0 = vadd.f32 1e-12, %v1215_v39 }
 0xc9c   :  { %2961 = vrsqrt.f32 %v1217_v0 }
 0xca2   :  { %v2960_v49 = vpop.eup %2959 }
 0xca3   :  { %v1220_v43 = vmul.f32 %v2960_v49, %v1204_v41 }
 0xca5   :  { %v1226_v55 = vmul.f32 %v1225_v59, %v1220_v43 }
 0xca6   :  { %v2962_v58 = vpop.eup %2961 }
 0xca7   :  { %v1221_v60 = vmul.f32 %v2962_v58, %v1205_v44  ;;  %v1232_v63 = vadd.f32 %v1231_v52, %v1226_v55 }
 0xca9   :  { %v1227_v1 = vmul.f32 %v1225_v59, %v1221_v60  ;;  %2598 = vmatprep.mubr.msk.f32.mxu1 %vm346_vm5, %v1232_v63 }
 0xcab   :  { %v1233_v11 = vadd.f32 %v1231_v52, %v1227_v1 }
 0xcad   :  { %2599 = vmatmul.mubr.msk.f32.vlgmr.msra.gmra.mrb[10].mxu1 %vm346_vm5, %v1233_v11 }
 0xd80   :  { %v2600_v16 = vpop.f32.mrb[10].mxu1 }
 0xd81   :  { %v1321_v28 = vadd.f32 %v2600_v16, %v1242_v14  ;;  %v1315_v19 = vpop.f32.mrb[11].mxu1 }
 0xd82   :  { %v1316_v21 = vadd.f32 %v1315_v19, %v1242_v14 }
 0xd83   :  { %v1325_v26 = vmul.f32 %v1321_v28, %v3358_v56  ;;  %v1329_v36 = vmul.f32 %v1321_v28, %v3384_v3  ;;  %v1331_v56 = vmul.f32 %v1321_v28, %v3398_v8 }
 0xd84   :  { %v3641_v41 = vpack.i.bf16 %v1321_v28, %v1316_v21  ;;  %v1324_v20 = vmul.f32 %v1316_v21, %v3337_v45  ;;  %v1326_v32 = vmul.f32 %v1316_v21, %v3363_v57  ;;  %v1327_v45 = vmul.f32 %v1321_v28, %v3370_v61 }
 0xd85   :  { %v1328_v33 = vmul.f32 %v1316_v21, %v3376_v62  ;;  %v1330_v54 = vmul.f32 %v1316_v21, %v3390_v5 }
 0xd86   :  { %2906 = vrot.lane.b32.xlu0 %v3641_v41, %s3067_s17  ;;  %2605 = vmatprep.mubr.msk.f32.mxu1 %vm346_vm5, %v1324_v20 }
 0xdf8   :  { %v2907_v44 = vpop.permute.xlu0 %2906 }
 0xdf9   :  { %v2909_v13 = vunpack.i.h.bf16 %v2907_v44  ;;  %v2908_v24 = vunpack.i.l.bf16 %v2907_v44 }
 0xdfb   :  { %v2821_v25 = vpack.c.bf16 %v2909_v13, %v2908_v24 }
 0xdfd   :  { %2823 = vmatprep.subr.msk.bf16.mxu1 %vm3347_vm6, %v2821_v25 }
 0xdfe   :  { %2826 = vmatpush3.bf16.xpose.msk.msra.mxu1 %vm3347_vm6, %v2821_v25 }
 0xe05   :  { %2606 = vmatmul.mubr.msk.f32.vlgmr.msra.gmra.mrb[12].mxu1 %vm346_vm5, %v1325_v26 }
 0xe06   :  { %2608 = vmatprep.mubr.msk.f32.mxu1 %vm346_vm5, %v1326_v32 }
 0xe09   :  { %2609 = vmatmul.mubr.msk.f32.gmra.mrb[14].mxu1 %vm346_vm5, %v1327_v45 }
 0xe0a   :  { %2611 = vmatprep.mubr.msk.f32.mxu1 %vm346_vm5, %v1328_v33 }
 0xe0d   :  { %2612 = vmatmul.mubr.msk.f32.gmra.mrb[16].mxu1 %vm346_vm5, %v1329_v36 }
 0xe0e   :  { %2614 = vmatprep.mubr.msk.f32.mxu1 %vm346_vm5, %v1330_v54 }
 0xe11   :  { %2615 = vmatmul.mubr.msk.f32.gmra.mrb[18].mxu1 %vm346_vm5, %v1331_v56 }
 0xed8   :  { %v2607_v57 = vpop.f32.mrb[12].mxu1 }
 0xed9   :  { %v1438_v61 = vadd.f32 %v2607_v57, %v3407_v10  ;;  %v1432_v62 = vpop.f32.mrb[13].mxu1 }
 0xeda   :  { %v1433_v35 = vadd.f32 %v1432_v62, %v3412_v12 }
 0xedb   :  { %v1474_v34 = vsel %vm60_vm1, %v1438_v61, -inf }
 0xedc   :  { %1475 = vmax.xlane.f32.xlu1 %v1474_v34  ;;  %v2610_v3 = vpop.f32.mrb[14].mxu1  ;;  %v1471_v5 = vsel %vm60_vm1, %v1433_v35, -inf }
 0xedd   :  { %v1448_v9 = vadd.f32 %v2610_v3, %v3420_v17  ;;  %v1442_v23 = vpop.f32.mrb[15].mxu1  ;;  %1472 = vmax.xlane.f32.xlu0 %v1471_v5 }
 0xede   :  { %v1443_v8 = vadd.f32 %v1442_v23, %v3427_v22 }
 0xedf   :  { %v1480_v38 = vsel %vm60_vm1, %v1448_v9, -inf }
 0xee0   :  { %1481 = vmax.xlane.f32.xlu1 %v1480_v38  ;;  %v2613_v46 = vpop.f32.mrb[16].mxu1  ;;  %v1477_v12 = vsel %vm60_vm1, %v1443_v8, -inf }
 0xee1   :  { %v1452_v10 = vpop.f32.mrb[17].mxu1  ;;  %v1458_v39 = vadd.f32 %v2613_v46, %v3447_v37 }
 0xee2   :  { %v1453_v49 = vadd.f32 %v1452_v10, %v3439_v31 }
 0xee3   :  { %v1486_v17 = vsel %vm60_vm1, %v1458_v39, -inf }
 0xee4   :  { %v2616_v0 = vpop.f32.mrb[18].mxu1  ;;  %1478 = vmax.xlane.f32.xlu1 %v1477_v12  ;;  %v1483_v22 = vsel %vm60_vm1, %v1453_v49, -inf }
 0xee5   :  { %v1462_v59 = vpop.f32.mrb[19].mxu1  ;;  %v1468_v52 = vadd.f32 %v2616_v0, %v3455_v42 }
 0xee6   :  { %v1463_v43 = vadd.f32 %v1462_v59, %v3434_v30 }
 0xee7   :  { %v1492_v37 = vsel %vm60_vm1, %v1468_v52, -inf }
 0xee8   :  { %1487 = vmax.xlane.f32.xlu1 %v1486_v17  ;;  %v1489_v55 = vsel %vm60_vm1, %v1463_v43, -inf }
 0xeec   :  { %1484 = vmax.xlane.f32.xlu1 %v1483_v22 }
 0xef0   :  { %1490 = vmax.xlane.f32.xlu1 %v1489_v55 }
 0xef4   :  { %1493 = vmax.xlane.f32.xlu1 %v1492_v37 }
 0xf69   :  { %v1476_v58 = vpop.xlane.xlu1 %1475 }
 0xf6a   :  { %v1496_v60 = vsub.f32 %v1438_v61, %v1476_v58  ;;  %v1473_v63 = vpop.xlane.xlu0 %1472 }
 0xf6b   :  { %v1495_v31 = vsub.f32 %v1433_v35, %v1473_v63 }
 0xf6c   :  { %v1505_v1 = vmul.f32 1.442695, %v1496_v60 }
 0xf6d   :  { %v1503_v11 = vmul.f32 1.442695, %v1495_v31  ;;  %v1482_v14 = vpop.xlane.xlu1 %1481 }
 0xf6e   :  { %2963 = vpow2.f32 %v1505_v1  ;;  %v1498_v30 = vsub.f32 %v1448_v9, %v1482_v14 }
 0xf6f   :  { %2965 = vpow2.f32 %v1503_v11 }
 0xf70   :  { %v1509_v16 = vmul.f32 1.442695, %v1498_v30 }
 0xf71   :  { %v1479_v28 = vpop.xlane.xlu1 %1478 }
 0xf72   :  { %2967 = vpow2.f32 %v1509_v16  ;;  %v1497_v42 = vsub.f32 %v1443_v8, %v1479_v28 }
 0xf74   :  { %v1507_v19 = vmul.f32 1.442695, %v1497_v42 }
 0xf75   :  { %v1488_v21 = vpop.xlane.xlu1 %1487 }
 0xf76   :  { %2969 = vpow2.f32 %v1507_v19  ;;  %v1500_v20 = vsub.f32 %v1458_v39, %v1488_v21 }
 0xf78   :  { %v3681_v44 = vpop.eup %2963  ;;  %v1513_v13 = vmul.f32 1.442695, %v1500_v20 }
 0xf79   :  { %v2966_v24 = vpop.eup %2965  ;;  %v1485_v25 = vpop.xlane.xlu1 %1484  ;;  %v1522_v26 = vsel %vm60_vm1, %v3681_v44, 0.0 }
 0xf7a   :  { %2971 = vpow2.f32 %v1513_v13  ;;  %v1499_v32 = vsub.f32 %v1453_v49, %v1485_v25  ;;  %1523 = vadd.xlane.f32.xlu0 %v1522_v26  ;;  %v1519_v45 = vsel %vm60_vm1, %v2966_v24, 0.0  ;;  %v2323_v26 = vld [vmem:[%s3900_s9 + $0x20] sm:$0xff] }
 0xf7b   :  { %1520 = vadd.xlane.f32.xlu1 %v1519_v45 }
 0xf7c   :  { %v2968_v33 = vpop.eup %2967  ;;  %v1511_v36 = vmul.f32 1.442695, %v1499_v32  ;;  %v2324_v32 = vld [vmem:[%s3900_s9 + $0x28] sm:$0xff] }
 0xf7d   :  { %v1491_v54 = vpop.xlane.xlu1 %1490  ;;  %v1528_v56 = vsel %vm60_vm1, %v2968_v33, 0.0  ;;  %v2831_v45 = vpack.c.bf16 %v2324_v32, %v2323_v26 }
 0xf7e   :  { %2973 = vpow2.f32 %v1511_v36  ;;  %v1501_v57 = vsub.f32 %v1463_v43, %v1491_v54  ;;  %1529 = vadd.xlane.f32.xlu0 %v1528_v56  ;;  %v2326_v36 = vld [vmem:[%s3900_s9 + $0x38] sm:$0xff] }
 0xf7f   :  { %2832 = vmatprep.subr.bf16.mxu1 %v2831_v45 }
 0xf80   :  { %v2970_v61 = vpop.eup %2969  ;;  %v1515_v62 = vmul.f32 1.442695, %v1501_v57  ;;  %2834 = vmatpush3.bf16.msra.mxu1 %v2831_v45  ;;  %v2329_v45 = vld [vmem:[%s3901_s10 + $0x20] sm:$0xff] }
 0xf81   :  { %v1494_v35 = vpop.xlane.xlu1 %1493  ;;  %v1525_v34 = vsel %vm60_vm1, %v2970_v61, 0.0 }
 0xf82   :  { %2975 = vpow2.f32 %v1515_v62  ;;  %v1502_v3 = vsub.f32 %v1468_v52, %v1494_v35  ;;  %1526 = vadd.xlane.f32.xlu1 %v1525_v34  ;;  %v3007_v62 = vld [vmem:[%s3897_s6 + $0x8] sm:$0xff]  ;;  %v3008_v34 = vld [vmem:[%s3897_s6 + $0x18] sm:$0xff] }
 0xf84   :  { %v2972_v5 = vpop.eup %2971  ;;  %v1517_v9 = vmul.f32 1.442695, %v1502_v3 }
 0xf85   :  { %v1534_v23 = vsel %vm60_vm1, %v2972_v5, 0.0 }
 0xf86   :  { %2977 = vpow2.f32 %v1517_v9  ;;  %1535 = vadd.xlane.f32.xlu0 %v1534_v23  ;;  %v3009_v9 = vld [vmem:[%s3897_s6] sm:$0xff] }
 0xf88   :  { %v2974_v8 = vpop.eup %2973 }
 0xf89   :  { %v1531_v38 = vsel %vm60_vm1, %v2974_v8, 0.0 }
 0xf8a   :  { %1532 = vadd.xlane.f32.xlu1 %v1531_v38 }
 0xf8c   :  { %v2976_v46 = vpop.eup %2975 }
 0xf8d   :  { %v1537_v10 = vsel %vm60_vm1, %v2976_v46, 0.0 }
 0xf8e   :  { %1538 = vadd.xlane.f32.xlu1 %v1537_v10 }
 0xf90   :  { %v2978_v39 = vpop.eup %2977 }
 0xf91   :  { %v1540_v12 = vsel %vm60_vm1, %v2978_v39, 0.0 }
 0xf92   :  { %1541 = vadd.xlane.f32.xlu0 %v1540_v12  ;;  %v3011_v12 = vld [vmem:[%s3897_s6 + $0x28] sm:$0xff] }
 0xf9f   :  { %2911 = vrot.lane.b32.xlu1 %v3641_v41, %s3068_s5 }
0x1007   :  { %v1524_v17 = vpop.xlane.xlu0 %1523 }
0x1008   :  { %v1521_v0 = vpop.xlane.xlu1 %1520 }
0x1009   :  { %2979 = vrcp.f32 %v1521_v0 }
0x100a   :  { %2981 = vrcp.f32 %v1524_v17 }
0x100b   :  { %v1530_v52 = vpop.xlane.xlu0 %1529 }
0x100f   :  { %v1527_v49 = vpop.xlane.xlu1 %1526 }
0x1010   :  { %2983 = vrcp.f32 %v1527_v49  ;;  %v3012_v49 = vld [vmem:[%s3897_s6 + $0x20] sm:$0xff] }
0x1011   :  { %2985 = vrcp.f32 %v1530_v52 }
0x1013   :  { %v2980_v59 = vpop.eup %2979  ;;  %v1536_v37 = vpop.xlane.xlu0 %1535 }
0x1014   :  { %v1551_v43 = vmul.f32 %v2980_v59, %v2966_v24  ;;  %v2982_v1 = vpop.eup %2981 }
0x1015   :  { %v1552_v14 = vmul.f32 %v2982_v1, %v3681_v44 }
0x1016   :  { %2621 = vmatprep.mubr.msk.f32.mxu0 %vm60_vm1, %v1551_v43 }
0x1017   :  { %v1533_v22 = vpop.xlane.xlu1 %1532 }
0x1018   :  { %2987 = vrcp.f32 %v1533_v22 }
0x1019   :  { %2989 = vrcp.f32 %v1536_v37 }
0x101a   :  { %v2984_v11 = vpop.eup %2983 }
0x101b   :  { %v1539_v55 = vpop.xlane.xlu1 %1538  ;;  %v2986_v30 = vpop.eup %2985  ;;  %v1553_v16 = vmul.f32 %v2984_v11, %v2970_v61  ;;  %v1799_v11 = vrot.slane %v3631_v48, %v3276_v51 }
0x101c   :  { %2991 = vrcp.f32 %v1539_v55  ;;  %v1554_v42 = vmul.f32 %v2986_v30, %v2968_v33  ;;  %v2325_v33 = vld [vmem:[%s3900_s9 + $0x30] sm:$0xff]  ;;  %v3013_v55 = vld [vmem:[%s3897_s6 + $0x38] sm:$0xff] }
0x101d   :  { %v2835_v54 = vpack.c.bf16 %v2326_v36, %v2325_v33  ;;  %v2330_v33 = vld [vmem:[%s3901_s10 + $0x28] sm:$0xff] }
0x101e   :  { %v2839_v36 = vpack.c.bf16 %v2330_v33, %v2329_v45 }
0x101f   :  { %v2912_v58 = vpop.permute.xlu1 %2911  ;;  %v1542_v31 = vpop.xlane.xlu0 %1541  ;;  %2836 = vmatprep.subr.bf16.mxu1 %v2835_v54 }
0x1020   :  { %v2914_v60 = vunpack.i.h.bf16 %v2912_v58  ;;  %v2913_v63 = vunpack.i.l.bf16 %v2912_v58  ;;  %2993 = vrcp.f32 %v1542_v31  ;;  %2838 = vmatpush3.bf16.msra.mxu1 %v2835_v54  ;;  %v2331_v54 = vld [vmem:[%s3901_s10 + $0x30] sm:$0xff] }
0x1021   :  { %2840 = vmatprep.subr.bf16.mxu1 %v2839_v36 }
0x1022   :  { %v2827_v41 = vpack.c.bf16 %v2914_v60, %v2913_v63  ;;  %v2988_v28 = vpop.eup %2987  ;;  %v3014_v60 = vld [vmem:[%s3897_s6 + $0x30] sm:$0xff] }
0x1023   :  { %v2990_v19 = vpop.eup %2989  ;;  %v1555_v21 = vmul.f32 %v2988_v28, %v2974_v8  ;;  %v3010_v8 = vld [vmem:[%s3897_s6 + $0x10] sm:$0xff] }
0x1024   :  { %2828 = vmatprep.subr.bf16.mxu0 %v2827_v41  ;;  %v1556_v13 = vmul.f32 %v2990_v19, %v2972_v5 }
0x1025   :  { %2830 = vmatpush3.bf16.msra.mxu0 %v2827_v41 }
0x1026   :  { %v2992_v20 = vpop.eup %2991 }
0x1027   :  { %v1557_v25 = vmul.f32 %v2992_v20, %v2976_v46 }
0x1028   :  { %2622 = vmatmul.mubr.msk.f32.vlgmr.msra.gmra.mrb[22].mxu0 %vm60_vm1, %v1552_v14 }
0x1029   :  { %2624 = vmatprep.mubr.msk.f32.mxu0 %vm60_vm1, %v1553_v16 }
0x102a   :  { %v2994_v24 = vpop.eup %2993 }
0x102b   :  { %v1558_v44 = vmul.f32 %v2994_v24, %v2978_v39 }
0x102c   :  { %2625 = vmatmul.mubr.msk.f32.gmra.mrb[24].mxu0 %vm60_vm1, %v1554_v42 }
0x102d   :  { %2627 = vmatprep.mubr.msk.f32.mxu0 %vm60_vm1, %v1555_v21 }
0x1030   :  { %2628 = vmatmul.mubr.msk.f32.gmra.mrb[26].mxu0 %vm60_vm1, %v1556_v13 }
0x1031   :  { %2630 = vmatprep.mubr.msk.f32.mxu0 %vm60_vm1, %v1557_v25 }
0x1034   :  { %2631 = vmatmul.mubr.msk.f32.gmra.mrb[28].mxu0 %vm60_vm1, %v1558_v44 }
0x10fb   :  { %v2623_v56 = vpop.f32.mrb[22].mxu0 }
0x10fc   :  { %v1655_v57 = vpop.f32.mrb[23].mxu0  ;;  %v1695_v35 = vmul.f32 %v3007_v62, %v2623_v56  ;;  %v2332_v56 = vld [vmem:[%s3901_s10 + $0x38] sm:$0xff] }
0x10fd   :  { %v1694_v23 = vmul.f32 %v3009_v9, %v1655_v57  ;;  %v2843_v57 = vpack.c.bf16 %v2332_v56, %v2331_v54  ;;  %v1831_v9 = vrot.slane %v3631_v48, %v980_v15  ;;  %v2335_v15 = vld [vmem:[%s3902_s11 + $0x80] sm:$0xff] }
0x10ff   :  { %v2626_v61 = vpop.f32.mrb[24].mxu0 }
0x1100   :  { %v1697_v3 = vmul.f32 %v3008_v34, %v2626_v61  ;;  %v1665_v5 = vpop.f32.mrb[25].mxu0 }
0x1101   :  { %v1696_v38 = vmul.f32 %v3010_v8, %v1665_v5 }
0x1102   :  { %v1703_v46 = vadd.f32 %v1697_v3, %v1695_v35 }
0x1103   :  { %v1702_v10 = vadd.f32 %v1696_v38, %v1694_v23  ;;  %v2629_v39 = vpop.f32.mrb[26].mxu0  ;;  %v1837_v38 = vrot.slane %v3631_v48, %v986_v47  ;;  %v2336_v47 = vld [vmem:[%s3902_s11 + $0x88] sm:$0xff] }
0x1104   :  { %v1699_v0 = vmul.f32 %v3011_v12, %v2629_v39  ;;  %v1675_v59 = vpop.f32.mrb[27].mxu0 }
0x1105   :  { %v1698_v17 = vmul.f32 %v3012_v49, %v1675_v59  ;;  %v2847_v49 = vpack.c.bf16 %v2336_v47, %v2335_v15 }
0x1106   :  { %v1705_v43 = vadd.f32 %v1703_v46, %v1699_v0 }
0x1107   :  { %v1704_v22 = vadd.f32 %v1702_v10, %v1698_v17  ;;  %v2632_v52 = vpop.f32.mrb[28].mxu0  ;;  %2848 = vmatprep.subr.bf16.mxu0 %v2847_v49  ;;  %v2337_v17 = vld [vmem:[%s3902_s11 + $0x90] sm:$0xff] }
0x1108   :  { %v1701_v37 = vmul.f32 %v3013_v55, %v2632_v52  ;;  %v1685_v58 = vpop.f32.mrb[29].mxu0  ;;  %2850 = vmatpush3.bf16.msra.mxu0 %v2847_v49  ;;  %v2339_v52 = vld [vmem:[%s3902_s11 + $0xa0] sm:$0xff]  ;;  %v2340_v55 = vld [vmem:[%s3902_s11 + $0xa8] sm:$0xff] }
0x1109   :  { %v1700_v63 = vmul.f32 %v3014_v60, %v1685_v58  ;;  %v2341_v58 = vld [vmem:[%s3902_s11 + $0xb0] sm:$0xff]  ;;  %v2342_v60 = vld [vmem:[%s3902_s11 + $0xb8] sm:$0xff] }
0x110a   :  { %v1707_v41 = vadd.f32 %v1705_v43, %v1701_v37  ;;  %v2338_v43 = vld [vmem:[%s3902_s11 + $0x98] sm:$0xff]  ;;  %v2855_v37 = vpack.c.bf16 %v2340_v55, %v2339_v52 }
0x110b   :  { %v1706_v31 = vadd.f32 %v1704_v22, %v1700_v63  ;;  %v2851_v22 = vpack.c.bf16 %v2338_v43, %v2337_v17  ;;  %v2859_v63 = vpack.c.bf16 %v2342_v60, %v2341_v58 }
0x110d   :  { %2641 = vmatprep.mubr.msk.f32.mxu1 %vm346_vm5, %v1706_v31  ;;  %2852 = vmatprep.subr.bf16.mxu0 %v2851_v22  ;;  %v2344_v31 = vld [vmem:[%s3902_s11 + $0xc8] sm:$0xff] }
0x110e   :  { %2642 = vmatmul.mubr.msk.f32.vlgmr.msra.gmra.mrb[20].mxu1 %vm346_vm5, %v1707_v41  ;;  %2854 = vmatpush3.bf16.msra.mxu0 %v2851_v22  ;;  %v2343_v41 = vld [vmem:[%s3902_s11 + $0xc0] sm:$0xff] }
0x110f   :  { %2842 = vmatpush3.bf16.msra.mxu1 %v2839_v36  ;;  %2856 = vmatprep.subr.bf16.mxu0 %v2855_v37 }
0x1110   :  { %2844 = vmatprep.subr.bf16.mxu1 %v2843_v57 }
0x1112   :  { %2858 = vmatpush3.bf16.msra.mxu0 %v2855_v37 }
0x1113   :  { %2846 = vmatpush3.bf16.msra.mxu1 %v2843_v57  ;;  %2860 = vmatprep.subr.bf16.mxu0 %v2859_v63 }
0x1114   :  { %2879 = vmatprep.subr.bf16.mxu1 %v3064_v2 }
0x1116   :  { %2862 = vmatpush3.bf16.msra.mxu0 %v2859_v63 }
0x11e1   :  { %v2643_v1 = vpop.f32.mrb[20].mxu1 }
0x11e2   :  { %v1785_v14 = vpop.f32.mrb[21].mxu1  ;;  %v1795_v30 = vadd.f32 %v2643_v1, %v3604_v6  ;;  %v2863_v1 = vpack.c.bf16 %v2344_v31, %v2343_v41 }
0x11e3   :  { %v1794_v16 = vadd.f32 %v1785_v14, %v3606_v7  ;;  %v2346_v14 = vld [vmem:[%s3902_s11 + $0xd8] sm:$0xff] }
0x11e4   :  { %v3747_v42 = vadd.f32 %v1799_v11, %v1795_v30  ;;  %2864 = vmatprep.subr.bf16.mxu0 %v2863_v1 }
0x11e5   :  { %v3745_v28 = vadd.f32 %v1799_v11, %v1794_v16  ;;  %2866 = vmatpush3.bf16.msra.mxu0 %v2863_v1  ;;  %v2345_v11 = vld [vmem:[%s3902_s11 + $0xd0] sm:$0xff]  ;;  %v2347_v16 = vld [vmem:[%s3902_s11 + $0xe0] sm:$0xff] }
0x11e6   :  { %v1805_v21 = vsel %vm346_vm5, %v3747_v42, 0.0  ;;  %v2867_v30 = vpack.c.bf16 %v2346_v14, %v2345_v11  ;;  %v3015_v11 = vld [vmem:[%s3905_s14 + $0x10] sm:$0xff] }
0x11e7   :  { %v1802_v19 = vsel %vm346_vm5, %v3745_v28, 0.0  ;;  %v2077_v14 = vrot.slane %v3015_v11, %v3313_v27  ;;  %v2086_v27 = vld [vmem:[%s3895_s4] sm:$0x3]  ;;  %s3069_s4 = smov [#allocation2]  }
0x11e8   :  { %1803 = vadd.xlane.f32.xlu0 %v1802_v19  ;;  %2868 = vmatprep.subr.bf16.mxu0 %v2867_v30  ;;  %v2348_v19 = vld [vmem:[%s3902_s11 + $0xe8] sm:$0xff]  ;;  %s2248_s6 = sshll.u32 %s3069_s4, 4  ;;  %s2249_s6 = int_to_ptr.vmem [resolvable:$true] %s2248_s6 }
0x11e9   :  { %2870 = vmatpush3.bf16.msra.mxu0 %v2867_v30  ;;  %s3016_s17 = scalar_lea.vmem %s2249_s6, 32  ;;  %p3021_p1 = scmp.lt.s32.totalorder %s2249_s6, %s2249_s6 }
0x11ea   :  { %p3017_p0 = scmp.ne.s32.totalorder %s2249_s6, %s3016_s17  ;;  %p3022_p2 = scmp.lt.s32.totalorder %s3016_s17, %s3016_s17 }
0x11ec   :  { %1806 = vadd.xlane.f32.xlu0 %v1805_v21  ;;  %v2871_v21 = vpack.c.bf16 %v2348_v19, %v2347_v16  ;;  %p3023_p3 = por %p3022_p2, %p3021_p1 }
0x11ee   :  { %2872 = vmatprep.subr.bf16.mxu0 %v2871_v21  ;;  %p3024_p4 = pnand %p3023_p3, %p3017_p0 }
0x11ef   :  { %2874 = vmatpush3.bf16.msra.mxu0 %v2871_v21  ;;  %v2083_v21 = vrot.slane %v3015_v11, %v3321_v29  ;;  %v2162_v29 = vld [vmem:[%s3903_s12 + $0x10] sm:$0xff] }
0x1275   :  { %v1804_v20 = vpop.xlane.xlu0 %1803 }
0x1276   :  { %v1808_v13 = vmul.f32 0.03125, %v1804_v20  ;;  %v2349_v20 = vld [vmem:[%s3902_s11 + $0xf0] sm:$0xff] }
0x1278   :  { %v1810_v51 = vsub.f32 %v3745_v28, %v1808_v13  ;;  %v2350_v13 = vld [vmem:[%s3902_s11 + $0xf8] sm:$0xff] }
0x1279   :  { %v1807_v24 = vpop.xlane.xlu0 %1806 }
0x127a   :  { %v1809_v6 = vmul.f32 0.03125, %v1807_v24  ;;  %v1812_v25 = vmul.f32 %v1810_v51, %v1810_v51  ;;  %v1848_v24 = vrot.slane %v3631_v48, %v996_v18 }
0x127c   :  { %v1811_v7 = vsub.f32 %v3747_v42, %v1809_v6  ;;  %v1814_v44 = vsel %vm346_vm5, %v1812_v25, 0.0 }
0x127d   :  { %1815 = vadd.xlane.f32.xlu0 %v1814_v44 }
0x127e   :  { %v1813_v26 = vmul.f32 %v1811_v7, %v1811_v7 }
0x1280   :  { %v1817_v32 = vsel %vm346_vm5, %v1813_v26, 0.0 }
0x1281   :  { %1818 = vadd.xlane.f32.xlu0 %v1817_v32 }
0x130a   :  { %v1816_v61 = vpop.xlane.xlu0 %1815 }
0x130b   :  { %v1820_v62 = vmul.f32 0.03125, %v1816_v61 }
0x130d   :  { %v1822_v35 = vadd.f32 1e-12, %v1820_v62 }
0x130e   :  { %v1819_v34 = vpop.xlane.xlu0 %1818 }
0x130f   :  { %2995 = vrsqrt.f32 %v1822_v35  ;;  %v1821_v3 = vmul.f32 0.03125, %v1819_v34 }
0x1311   :  { %v1823_v5 = vadd.f32 1e-12, %v1821_v3 }
0x1313   :  { %2997 = vrsqrt.f32 %v1823_v5 }
0x1319   :  { %v2996_v23 = vpop.eup %2995 }
0x131a   :  { %v1826_v8 = vmul.f32 %v2996_v23, %v1810_v51  ;;  %v2875_v51 = vpack.c.bf16 %v2350_v13, %v2349_v20 }
0x131c   :  { %v1832_v46 = vmul.f32 %v1831_v9, %v1826_v8  ;;  %2876 = vmatprep.subr.bf16.mxu0 %v2875_v51 }
0x131d   :  { %v2998_v10 = vpop.eup %2997  ;;  %2878 = vmatpush3.bf16.msra.mxu0 %v2875_v51 }
0x131e   :  { %v1827_v39 = vmul.f32 %v2998_v10, %v1811_v7  ;;  %v1838_v12 = vadd.f32 %v1837_v38, %v1832_v46 }
0x1320   :  { %v1833_v0 = vmul.f32 %v1831_v9, %v1827_v39  ;;  %2652 = vmatprep.mubr.msk.f32.mxu1 %vm346_vm5, %v1838_v12 }
0x1322   :  { %v1839_v59 = vadd.f32 %v1837_v38, %v1833_v0  ;;  %v2045_v38 = vrot.slane %v3631_v48, %v1192_v53 }
0x1324   :  { %2653 = vmatmul.mubr.msk.f32.vlgmr.msra.gmra.mrb[22].mxu1 %vm346_vm5, %v1839_v59 }
0x1325   :  { %2694 = vmatprep.mubr.msk.f32.mxu1 %vm3065_vm0, %v3066_v4 }
0x13f7   :  { %v2654_v6 = vpop.f32.mrb[22].mxu1 }
0x13f8   :  { %v1927_v25 = vadd.f32 %v2654_v6, %v1848_v24  ;;  %v1921_v7 = vpop.f32.mrb[23].mxu1  ;;  %v2161_v6 = vld [vmem:[%s3903_s12 + $0x8] sm:$0xff] }
0x13f9   :  { %v1922_v44 = vadd.f32 %v1921_v7, %v1848_v24  ;;  %v2160_v24 = vld [vmem:[%s3903_s12] sm:$0xff] }
0x13fa   :  { %v1931_v26 = vmul.f32 %v1927_v25, %v1927_v25  ;;  %v2883_v7 = vpack.c.bf16 %v2161_v6, %v2160_v24 }
0x13fb   :  { %v1930_v32 = vmul.f32 %v1922_v44, %v1922_v44 }
0x13fc   :  { %v1933_v45 = vmul.f32 %v1931_v26, %v1927_v25 }
0x13fd   :  { %v1932_v33 = vmul.f32 %v1930_v32, %v1922_v44 }
0x13fe   :  { %v1935_v36 = vmul.f32 0.044715, %v1933_v45 }
0x13ff   :  { %v1934_v54 = vmul.f32 0.044715, %v1932_v33 }
0x1400   :  { %v1937_v56 = vadd.f32 %v1935_v36, %v1927_v25 }
0x1401   :  { %v1936_v57 = vadd.f32 %v1934_v54, %v1922_v44 }
0x1402   :  { %v1939_v61 = vmul.f32 0.7978846, %v1937_v56 }
0x1403   :  { %v1938_v62 = vmul.f32 0.7978846, %v1936_v57 }
0x1404   :  { %2999 = vtanh.f32 %v1939_v61 }
0x1405   :  { %3001 = vtanh.f32 %v1938_v62 }
0x140e   :  { %v3000_v35 = vpop.eup %2999 }
0x140f   :  { %v3002_v34 = vpop.eup %3001  ;;  %v1943_v3 = vadd.f32 1.0, %v3000_v35 }
0x1410   :  { %v1942_v18 = vadd.f32 1.0, %v3002_v34 }
0x1411   :  { %v1945_v5 = vmul.f32 0.5, %v1943_v3 }
0x1412   :  { %v1944_v9 = vmul.f32 0.5, %v1942_v18 }
0x1413   :  { %v1947_v8 = vmul.f32 %v1945_v5, %v1927_v25 }
0x1414   :  { %v1946_v23 = vmul.f32 %v1944_v9, %v1922_v44  ;;  %v2163_v44 = vld [vmem:[%s3903_s12 + $0x18] sm:$0xff] }
0x1415   :  { %v2886_v26 = vpack.c.bf16 %v2163_v44, %v2162_v29 }
0x1416   :  { %2687 = vmatprep.mubr.f32.mxu0 %v1946_v23 }
0x1417   :  { %2688 = vmatmul.mubr.f32.vlgmr.msra.gmra.mrb[30].mxu0 %v1947_v8 }
0x14ea   :  { %v2689_v46 = vpop.f32.mrb[30].mxu0 }
0x14eb   :  { %v2041_v10 = vadd.f32 %v2689_v46, %v3747_v42  ;;  %v2031_v39 = vpop.f32.mrb[31].mxu0 }
0x14ec   :  { %v2040_v12 = vadd.f32 %v2031_v39, %v3745_v28 }
0x14ed   :  { %v2047_v0 = vadd.f32 %v2045_v38, %v2041_v10 }
0x14ee   :  { %v2046_v59 = vadd.f32 %v2045_v38, %v2040_v12 }
0x14ef   :  { %v2051_v15 = vsel %vm346_vm5, %v2047_v0, 0.0 }
0x14f0   :  { %2052 = vadd.xlane.f32.xlu1 %v2051_v15  ;;  %v2048_v47 = vsel %vm346_vm5, %v2046_v59, 0.0 }
0x14f1   :  { %2049 = vadd.xlane.f32.xlu0 %v2048_v47 }
0x157d   :  { %v2053_v49 = vpop.xlane.xlu1 %2052 }
0x157e   :  { %v2055_v17 = vmul.f32 0.03125, %v2053_v49  ;;  %v2050_v43 = vpop.xlane.xlu0 %2049 }
0x157f   :  { %v2054_v50 = vmul.f32 0.03125, %v2050_v43 }
0x1580   :  { %v2057_v22 = vsub.f32 %v2047_v0, %v2055_v17 }
0x1581   :  { %v2056_v53 = vsub.f32 %v2046_v59, %v2054_v50 }
0x1582   :  { %v2059_v52 = vmul.f32 %v2057_v22, %v2057_v22 }
0x1583   :  { %v2058_v48 = vmul.f32 %v2056_v53, %v2056_v53 }
0x1584   :  { %v2063_v28 = vsel %vm346_vm5, %v2059_v52, 0.0 }
0x1585   :  { %v2060_v42 = vsel %vm346_vm5, %v2058_v48, 0.0 }
0x1586   :  { %2061 = vadd.xlane.f32.xlu0 %v2060_v42 }
0x158a   :  { %2064 = vadd.xlane.f32.xlu0 %v2063_v28 }
0x1613   :  { %v2062_v55 = vpop.xlane.xlu0 %2061 }
0x1614   :  { %v2066_v37 = vmul.f32 0.03125, %v2062_v55 }
0x1616   :  { %v2068_v58 = vadd.f32 1e-12, %v2066_v37 }
0x1617   :  { %v2065_v60 = vpop.xlane.xlu0 %2064 }
0x1618   :  { %3003 = vrsqrt.f32 %v2068_v58  ;;  %v2067_v63 = vmul.f32 0.03125, %v2065_v60 }
0x161a   :  { %v2069_v41 = vadd.f32 1e-12, %v2067_v63 }
0x161c   :  { %3005 = vrsqrt.f32 %v2069_v41 }
0x1622   :  { %v3004_v31 = vpop.eup %3003 }
0x1623   :  { %v2072_v1 = vmul.f32 %v3004_v31, %v2056_v53 }
0x1625   :  { %v2078_v19 = vmul.f32 %v2077_v14, %v2072_v1 }
0x1626   :  { %v3006_v30 = vpop.eup %3005 }
0x1627   :  { %v2073_v16 = vmul.f32 %v3006_v30, %v2057_v22  ;;  %v2084_v13 = vadd.f32 %v2083_v21, %v2078_v19 }
0x1629   :  { %v2079_v20 = vmul.f32 %v2077_v14, %v2073_v16 }
0x162b   :  { %v2085_v51 = vadd.f32 %v2083_v21, %v2079_v20 }
0x162d   :  { %v2880_v25 = vpack.c.bf16 %v2085_v51, %v2084_v13 }
0x162f   :  { %2881 = vmatpush3.bf16.msra.mxu1 %v2880_v25 }
0x1630   :  { %2882 = vmatprep.subr.bf16.mxu1 %v3064_v2 }
0x1632   :  { %2695 = vmatmul.mubr.msk.f32.vlgmr.msra.gmra.mrb[24].mxu1 %vm60_vm1, %v2086_v27 }
0x1633   :  { %2884 = vmatpush3.bf16.msra.mxu1 %v2883_v7  ;;  %2705 = vmatprep.mubr.msk.f32.mxu1 %vm3065_vm0, %v3066_v4 }
0x1634   :  { %2885 = vmatprep.subr.bf16.mxu1 %v3064_v2 }
0x1637   :  { %2887 = vmatpush3.bf16.msra.mxu1 %v2886_v26 }
0x1705   :  { %v2156_v32 = vpop.f32.mrb[24].mxu1 }
0x1706   :  { %v2696_v45 = vpop.f32.mrb[25].mxu1  ;;  %2706 = vmatmul.mubr.msk.f32.vlgmr.msra.gmra.mrb[26].mxu1 %vm346_vm5, %v2156_v32 }
0x1707   :  { %3027 = shalt.err (!%p3024_p4)
}
0x1708   :  { %s3028_s26 = scalar_lea.hbm %s3906_s15, 32 }
0x1709   :  { %p3029_p5 = scmp.ne.s32.totalorder %s3906_s15, %s3028_s26  ;;  %p3032_p6 = scmp.lt.u32.totalorder %s3028_s26, %s3906_s15 }
0x170b   :  { %p3034_p7 = pnand %p3032_p6, %p3029_p5 }
0x170d   :  { %3037 = shalt.err (!%p3034_p7)
}
0x170e   :  { %2251 = dma.vmem_to_hbm [thread:$0]  %s2249_s6, 32, %s3906_s15, [#allocation3]   ;;  %v2167_v2 = vrot.slane %v3015_v11, %v3330_v40 }
0x170f   :  { %s3070_s3 = smov [#allocation4]  }
0x1710   :  { %s2258_s13 = sshll.u32 %s3070_s3, 4  ;;  %s2259_s13 = int_to_ptr.vmem [resolvable:$true] %s2258_s13 }
0x1711   :  { %s3038_s7 = scalar_lea.vmem %s2259_s13, 32  ;;  %p3043_p9 = scmp.lt.s32.totalorder %s2259_s13, %s2259_s13 }
0x1712   :  { %p3039_p8 = scmp.ne.s32.totalorder %s2259_s13, %s3038_s7  ;;  %p3044_p10 = scmp.lt.s32.totalorder %s3038_s7, %s3038_s7 }
0x1714   :  { %p3045_p11 = por %p3044_p10, %p3043_p9 }
0x1716   :  { %p3046_p12 = pnand %p3045_p11, %p3039_p8 }
0x17d9   :  { %v2237_v4 = vpop.f32.mrb[26].mxu1 }
0x17da   :  { %v2238_v33 = vadd.f32 %v2237_v4, %v2167_v2  ;;  %v2707_v36 = vpop.f32.mrb[27].mxu1 }
0x17dc   :  { %2241 = vst [vmem:[#allocation4] sm:$0x3] %v2238_v33 }
0x17dd   :  { %3049 = shalt.err (!%p3046_p12)
}
0x17de   :  { %s3050_s15 = scalar_lea.hbm %s3907_s16, 32 }
0x17df   :  { %p3051_p13 = scmp.ne.s32.totalorder %s3907_s16, %s3050_s15  ;;  %p3054_p0 = scmp.lt.u32.totalorder %s3050_s15, %s3907_s16 }
0x17e1   :  { %p3056_p1 = pnand %p3054_p0, %p3051_p13 }
0x17e3   :  { %3059 = shalt.err (!%p3056_p1)
}
0x17e4   :  { %2261 = dma.vmem_to_hbm [thread:$0]  %s2259_s13, 32, %s3907_s16, [#allocation5]  }
0x17e5   :  { %3060 = dma.done.wait [#allocation3], 32  }
0x17e6   :  { %3061 = vsyncadd [#allocation3], 4294967264 }
0x17e7   :  { %3062 = dma.done.wait [#allocation5], 32  }
0x17e8   :  { %3063 = vsyncadd [#allocation5], 4294967264 }
0x17e9   :  { %2268 = vsyncpa [#allocation3], 1 }
0x17ea   :  { %2269 = vsyncpa [#allocation5], 1 }

</bundles_post_ra>
